<compile_context>
chip_gen: v6e
topology: v6e:2x2x1
jax: 0.10.0
libtpu: 0.0.40
codegen_flags: <defaults>
</compile_context>

<pallas_src>
import functools
import math

import jax
import jax.numpy as jnp
import numpy as np
from jax.experimental import pallas as pl
from jax.experimental.pallas import tpu as pltpu

# ---------------- small config consistent with GemmaConfig -------------------
BATCH = 2
SEQ = 8
HIDDEN = 32
NUM_HEADS = 4
NUM_KV_HEADS = 2
HEAD_DIM = 128           # (Gemma default is 256; 128 keeps things small & lane-aligned)
ROPE_THETA = 10000.0
# The reference forward calls repeat_kv(k, num_key_value_heads); its einsum only
# works when num_kv_heads * num_kv_heads == num_heads.  We follow those exact
# module semantics (standard GQA would use n_rep = num_heads // num_kv_heads):
# head h reads kv-head h // N_REP.
N_REP = NUM_KV_HEADS
assert NUM_KV_HEADS * N_REP == NUM_HEADS
assert HIDDEN % NUM_HEADS == 0
assert HEAD_DIM % 128 == 0   # keeps all per-head lane slices tile-aligned

_Q_N = NUM_HEADS * HEAD_DIM                  # 512
_K_OFF = _Q_N                                # 512
_V_OFF = _Q_N + NUM_KV_HEADS * HEAD_DIM      # 768
_QKV_N = _Q_N + 2 * NUM_KV_HEADS * HEAD_DIM  # 1024  (lane-dense fused matmul)


def _round_up(x, m):
    return (x + m - 1) // m * m


# ---------------- fused QKV + RoPE + attention + o-proj kernel ---------------
def _fused_attn_kernel(*refs, has_mask, return_weights, matmul_dtype, approx_recip):
    md = matmul_dtype
    x_ref, wqkv_ref, wo_ref, cos_ref, sin_ref = refs[:5]
    i = 5
    mask_ref = None
    if has_mask:
        mask_ref = refs[i]
        i += 1
    out_ref = refs[i]
    i += 1
    w_ref = refs[i] if return_weights else None

    x = x_ref[0]            # (S, Hp)  f32
    cos = cos_ref[0]        # (S, D)   f32
    sin = sin_ref[0]        # (S, D)   f32, sign-folded (rotate_half sign baked in)
    S = x.shape[0]
    D = HEAD_DIM
    Hp = wo_ref.shape[1]

    if has_mask:
        mask = mask_ref[0, 0]                                    # (S, S) f32
    else:
        # In-kernel causal mask: a few VPU ops instead of an (S,S) f32 HBM read.
        row = jax.lax.broadcasted_iota(jnp.int32, (S, S), 0)
        col = jax.lax.broadcasted_iota(jnp.int32, (S, S), 1)
        mask = jnp.where(row >= col, 0.0, -1e9).astype(jnp.float32)
    mask_grp = jnp.concatenate([mask] * N_REP, axis=0)           # (N_REP*S, S)

    # Fused q/k/v projection: one wide lane-dense MXU matmul.
    # (1/sqrt(D) softmax scale is pre-folded into the q columns of wqkv.)
    qkv = jnp.dot(x.astype(md), wqkv_ref[...],
                  preferred_element_type=jnp.float32)            # (S, _QKV_N) f32

    def rope(t):  # (S, D) f32 -> (S, D) f32 ; rotate_half sign lives in `sin`
        return t * cos + pltpu.roll(t, shift=D // 2, axis=1) * sin

    out_acc = jnp.zeros((S, Hp), jnp.float32)
    for g in range(NUM_KV_HEADS):
        # kv head g is shared by heads h = g*N_REP .. g*N_REP + N_REP - 1.
        k_g = qkv[:, _K_OFF + g * D:_K_OFF + (g + 1) * D]        # (S, D)
        v_g = qkv[:, _V_OFF + g * D:_V_OFF + (g + 1) * D]        # (S, D)
        k_r = rope(k_g).astype(md)                               # RoPE once per kv head
        v_c = v_g.astype(md)

        # Batch the group's q heads along rows -> one fat scores matmul (M=N_REP*S).
        q_rows = jnp.concatenate(
            [rope(qkv[:, (g * N_REP + r) * D:(g * N_REP + r + 1) * D]).astype(md)
             for r in range(N_REP)], axis=0)                     # (N_REP*S, D)

        s = jax.lax.dot_general(q_rows, k_r, (((1,), (1,)), ((), ())),
                                preferred_element_type=jnp.float32)  # (N_REP*S, S)
        s = s + mask_grp                                         # scale already folded in
        m = jnp.max(s, axis=-1, keepdims=True)
        e = jnp.exp(s - m)
        l = jnp.sum(e, axis=-1, keepdims=True)
        inv_l = pl.reciprocal(l, approx=approx_recip)            # (N_REP*S, 1)

        # Deferred softmax normalization: normalize the (.., D) context, not (.., S).
        ctx = jnp.dot(e.astype(md), v_c,
                      preferred_element_type=jnp.float32)        # (N_REP*S, D)
        ctx = ctx * inv_l

        for r in range(N_REP):
            h = g * N_REP + r
            if w_ref is not None:
                w_ref[0, h] = (e[r * S:(r + 1) * S] *
                               inv_l[r * S:(r + 1) * S]).astype(w_ref.dtype)
            ctx_h = ctx[r * S:(r + 1) * S]                       # (S, D)
            # Per-head o-projection accumulation (no (S, NH*D) lane concat).
            out_acc = out_acc + jnp.dot(ctx_h.astype(md),
                                        wo_ref[h * D:(h + 1) * D, :],
                                        preferred_element_type=jnp.float32)

    out_ref[0] = out_acc.astype(out_ref.dtype)


# ---------------- RoPE tables (hoistable for static position_ids) ------------
def rope_tables(position_ids):
    inv_freq = 1.0 / (ROPE_THETA ** (jnp.arange(0, HEAD_DIM, 2,
                                                dtype=jnp.float32) / HEAD_DIM))
    freqs = position_ids.astype(jnp.float32)[:, :, None] * inv_freq[None, None, :]
    emb = jnp.concatenate([freqs, freqs], axis=-1)               # (B, S, D)
    return jnp.cos(emb), jnp.sin(emb)


def rope_tables_signed(position_ids):
    """cos, and sin with the rotate_half sign folded in (no in-kernel iota/where)."""
    cos, sin = rope_tables(position_ids)
    sign = jnp.where(jnp.arange(HEAD_DIM) < HEAD_DIM // 2, -1.0, 1.0
                     ).astype(jnp.float32)
    return cos, sin * sign[None, None, :]


# ---------------- one-time weight preparation (hoist out of the forward) -----
def prepare_params(params, matmul_dtype=jnp.bfloat16):
    """Fuse q|k|v, fold softmax scale into q, pad hidden to a lane multiple,
    pre-cast to the MXU operand dtype.  Call once, reuse every forward."""
    H = params["q_w"].shape[0]
    Hp = max(_round_up(H, 128), 128)
    scale = 1.0 / math.sqrt(HEAD_DIM)
    w_qkv = jnp.concatenate([params["q_w"] * scale, params["k_w"], params["v_w"]],
                            axis=1)                              # (H, _QKV_N)
    w_qkv = jnp.pad(w_qkv, ((0, Hp - H), (0, 0))).astype(matmul_dtype)
    w_o = jnp.pad(params["o_w"], ((0, 0), (0, Hp - H))).astype(matmul_dtype)
    return {"w_qkv": w_qkv, "w_o": w_o, "hidden": H, "hidden_padded": Hp,
            "matmul_dtype": matmul_dtype}


# ---------------- full GemmaAttention forward (single pallas_call) -----------
def gemma_attention_forward(prepared, hidden_states, attention_mask, position_ids,
                            *, return_attn_weights=False,
                            causal_mask_in_kernel=False,
                            rope_cache=None):
    B, S, H = hidden_states.shape
    assert H == prepared["hidden"]
    Hp = prepared["hidden_padded"]
    md = prepared["matmul_dtype"]
    D = HEAD_DIM

    if rope_cache is None:
        cos, sin_signed = rope_tables_signed(position_ids)
    else:
        cos, sin_signed = rope_cache

    x = hidden_states
    if Hp != H:
        # Lane-dense x / out blocks (real Gemma hidden sizes already satisfy this).
        x = jnp.pad(x, ((0, 0), (0, 0), (0, Hp - H)))

    in_specs = [
        pl.BlockSpec((1, S, Hp), lambda b: (b, 0, 0)),           # hidden_states (padded)
        pl.BlockSpec((Hp, _QKV_N), lambda b: (0, 0)),            # fused qkv weight
        pl.BlockSpec((_Q_N, Hp), lambda b: (0, 0)),              # o-proj weight
        pl.BlockSpec((1, S, D), lambda b: (b, 0, 0)),            # cos
        pl.BlockSpec((1, S, D), lambda b: (b, 0, 0)),            # sin (sign-folded)
    ]
    inputs = [x, prepared["w_qkv"], prepared["w_o"], cos, sin_signed]
    if not causal_mask_in_kernel:
        assert attention_mask is not None, "Attention mask must be provided"
        in_specs.append(pl.BlockSpec((1, 1, S, S), lambda b: (b, 0, 0, 0)))
        inputs.append(attention_mask)

    out_shapes = [jax.ShapeDtypeStruct((B, S, Hp), hidden_states.dtype)]
    out_specs = [pl.BlockSpec((1, S, Hp), lambda b: (b, 0, 0))]
    if return_attn_weights:
        out_shapes.append(jax.ShapeDtypeStruct((B, NUM_HEADS, S, S), jnp.float32))
        out_specs.append(pl.BlockSpec((1, NUM_HEADS, S, S),
                                      lambda b: (b, 0, 0, 0)))

    kernel = functools.partial(
        _fused_attn_kernel,
        has_mask=not causal_mask_in_kernel,
        return_weights=return_attn_weights,
        matmul_dtype=md,
        approx_recip=(jnp.dtype(md) != jnp.dtype(jnp.float32)))

    result = pl.pallas_call(
        kernel,
        out_shape=tuple(out_shapes),
        grid=(B,),
        in_specs=in_specs,
        out_specs=tuple(out_specs),
        compiler_params=pltpu.CompilerParams(
            dimension_semantics=("parallel",),
            vmem_limit_bytes=32 * 1024 * 1024),  # safe on v5e/v6e/v7x at this tile size
    )(*inputs)

    out = result[0][..., :H] if Hp != H else result[0]
    attn_w = result[1] if return_attn_weights else None
    return out, attn_w


# ---------------- pure-JAX reference (for correctness check) -----------------
def _repeat_kv_ref(x, n_rep):
    b, nkv, s, d = x.shape
    if n_rep == 1:
        return x
    return jnp.broadcast_to(x[:, :, None], (b, nkv, n_rep, s, d)).reshape(
        b, nkv * n_rep, s, d)


def _rotate_half(x):
    d = x.shape[-1]
    return jnp.concatenate([-x[..., d // 2:], x[..., :d // 2]], axis=-1)


def reference_forward(params, hidden_states, attention_mask, position_ids):
    B, S, H = hidden_states.shape
    q = (hidden_states @ params["q_w"]).reshape(B, S, NUM_HEADS, HEAD_DIM).transpose(0, 2, 1, 3)
    k = (hidden_states @ params["k_w"]).reshape(B, S, NUM_KV_HEADS, HEAD_DIM).transpose(0, 2, 1, 3)
    v = (hidden_states @ params["v_w"]).reshape(B, S, NUM_KV_HEADS, HEAD_DIM).transpose(0, 2, 1, 3)
    cos, sin = rope_tables(position_ids)
    cos = cos[:, None]
    sin = sin[:, None]
    q = q * cos + _rotate_half(q) * sin
    k = k * cos + _rotate_half(k) * sin
    k = _repeat_kv_ref(k, NUM_KV_HEADS)
    v = _repeat_kv_ref(v, NUM_KV_HEADS)
    s = jnp.einsum('bnqd,bnkd->bnqk', q, k) / math.sqrt(HEAD_DIM) + attention_mask
    w = jax.nn.softmax(s.astype(jnp.float32), axis=-1)
    o = jnp.einsum('bnqk,bnkd->bnqd', w, v)
    o = o.transpose(0, 2, 1, 3).reshape(B, S, NUM_HEADS * HEAD_DIM)
    return o @ params["o_w"], w


# -----------------------------------------------------------------------------
if __name__ == "__main__":
    key = jax.random.PRNGKey(0)
    k1, k2, k3, k4, k5 = jax.random.split(key, 5)
    params = {
        "q_w": jax.random.normal(k1, (HIDDEN, NUM_HEADS * HEAD_DIM), jnp.float32) * 0.05,
        "k_w": jax.random.normal(k2, (HIDDEN, NUM_KV_HEADS * HEAD_DIM), jnp.float32) * 0.05,
        "v_w": jax.random.normal(k3, (HIDDEN, NUM_KV_HEADS * HEAD_DIM), jnp.float32) * 0.05,
        "o_w": jax.random.normal(k4, (NUM_HEADS * HEAD_DIM, HIDDEN), jnp.float32) * 0.05,
    }
    hidden_states = jax.random.normal(k5, (BATCH, SEQ, HIDDEN), jnp.float32)
    position_ids = jnp.broadcast_to(jnp.arange(SEQ, dtype=jnp.int32)[None, :],
                                    (BATCH, SEQ))
    causal = jnp.where(jnp.arange(SEQ)[:, None] >= jnp.arange(SEQ)[None, :],
                       0.0, -1e9).astype(jnp.float32)
    attention_mask = jnp.broadcast_to(causal[None, None], (BATCH, 1, SEQ, SEQ))

    ref_out, ref_w = reference_forward(params, hidden_states,
                                       attention_mask, position_ids)

    # --- f32 MXU-operand path, attention weights requested: tight check -----
    prep_f32 = prepare_params(params, matmul_dtype=jnp.float32)
    out, attn_w = gemma_attention_forward(prep_f32, hidden_states, attention_mask,
                                          position_ids, return_attn_weights=True)
    jax.block_until_ready((out, attn_w))
    assert out.shape == (BATCH, SEQ, HIDDEN)
    assert attn_w.shape == (BATCH, NUM_HEADS, SEQ, SEQ)
    np.testing.assert_allclose(np.asarray(out), np.asarray(ref_out),
                               rtol=1e-4, atol=1e-4)
    np.testing.assert_allclose(np.asarray(attn_w), np.asarray(ref_w),
                               rtol=1e-4, atol=1e-4)

    # --- default bf16 fast path (no attn-weights writeback): loose check ----
    prep_bf16 = prepare_params(params)          # bf16 MXU operands by default
    out2, w2 = gemma_attention_forward(prep_bf16, hidden_states, attention_mask,
                                       position_ids)
    jax.block_until_ready(out2)
    assert w2 is None
    np.testing.assert_allclose(np.asarray(out2), np.asarray(ref_out),
                               rtol=2e-2, atol=2e-2)

    # --- in-kernel causal mask path (no (B,1,S,S) mask DMA) -----------------
    out3, _ = gemma_attention_forward(prep_bf16, hidden_states, None, position_ids,
                                      causal_mask_in_kernel=True)
    jax.block_until_ready(out3)
    np.testing.assert_allclose(np.asarray(out3), np.asarray(ref_out),
                               rtol=2e-2, atol=2e-2)

    print("KERNEL_OK")
</pallas_src>

<mosaic_0001>
module attributes {stable_mosaic.version = 11 : i64} {
  func.func @_fused_attn_kernel(%arg0: i32, %arg1: memref<1x8x128xf32, #tpu.memory_space<vmem>>, %arg2: memref<128x1024xf32, #tpu.memory_space<vmem>>, %arg3: memref<512x128xf32, #tpu.memory_space<vmem>>, %arg4: memref<1x8x128xf32, #tpu.memory_space<vmem>>, %arg5: memref<1x8x128xf32, #tpu.memory_space<vmem>>, %arg6: memref<1x1x8x8xf32, #tpu.memory_space<vmem>>, %arg7: memref<1x8x128xf32, #tpu.memory_space<vmem>>, %arg8: memref<1x4x8x8xf32, #tpu.memory_space<vmem>>) attributes {dimension_semantics = [#tpu.dimension_semantics<parallel>], iteration_bounds = array<i64: 2>, scalar_prefetch = 0 : i64, scratch_operands = 0 : i64, tpu.core_type = #tpu.core_type<tc>, window_params = [{transform_indices = @transform_0, window_bounds = array<i64: 1, 8, 128>}, {pipeline_mode = #tpu.pipeline_mode<synchronous>, transform_indices = @transform_1, window_bounds = array<i64: 128, 1024>}, {pipeline_mode = #tpu.pipeline_mode<synchronous>, transform_indices = @transform_2, window_bounds = array<i64: 512, 128>}, {transform_indices = @transform_3, window_bounds = array<i64: 1, 8, 128>}, {transform_indices = @transform_4, window_bounds = array<i64: 1, 8, 128>}, {transform_indices = @transform_5, window_bounds = array<i64: 1, 1, 8, 8>}, {transform_indices = @transform_6, window_bounds = array<i64: 1, 8, 128>}, {transform_indices = @transform_7, window_bounds = array<i64: 1, 4, 8, 8>}]} {
    %c0 = arith.constant 0 : index
    %c0_0 = arith.constant 0 : index
    %c0_1 = arith.constant 0 : index
    %0 = vector.load %arg1[%c0, %c0_0, %c0_1] : memref<1x8x128xf32, #tpu.memory_space<vmem>>, vector<1x8x128xf32>
    %1 = vector.shape_cast %0 : vector<1x8x128xf32> to vector<8x128xf32>
    %c0_2 = arith.constant 0 : index
    %c0_3 = arith.constant 0 : index
    %c0_4 = arith.constant 0 : index
    %2 = vector.load %arg4[%c0_2, %c0_3, %c0_4] : memref<1x8x128xf32, #tpu.memory_space<vmem>>, vector<1x8x128xf32>
    %3 = vector.shape_cast %2 : vector<1x8x128xf32> to vector<8x128xf32>
    %c0_5 = arith.constant 0 : index
    %c0_6 = arith.constant 0 : index
    %c0_7 = arith.constant 0 : index
    %4 = vector.load %arg5[%c0_5, %c0_6, %c0_7] : memref<1x8x128xf32, #tpu.memory_space<vmem>>, vector<1x8x128xf32>
    %5 = vector.shape_cast %4 : vector<1x8x128xf32> to vector<8x128xf32>
    %c0_8 = arith.constant 0 : index
    %c0_9 = arith.constant 0 : index
    %c0_10 = arith.constant 0 : index
    %c0_11 = arith.constant 0 : index
    %6 = vector.load %arg6[%c0_8, %c0_9, %c0_10, %c0_11] : memref<1x1x8x8xf32, #tpu.memory_space<vmem>>, vector<1x1x8x8xf32>
    %7 = vector.shape_cast %6 : vector<1x1x8x8xf32> to vector<8x8xf32>
    %8 = tpu.concatenate %7, %7 in 0 : vector<8x8xf32>, vector<8x8xf32> -> vector<16x8xf32>
    %c0_12 = arith.constant 0 : index
    %c0_13 = arith.constant 0 : index
    %9 = vector.load %arg2[%c0_12, %c0_13] : memref<128x1024xf32, #tpu.memory_space<vmem>>, vector<128x1024xf32>
    %cst = arith.constant dense<0.000000e+00> : vector<8x1024xf32>
    %10 = tpu.matmul %1, %9, %cst {dimension_numbers = #tpu.dot_dimension_numbers<[1], [0], [0], [1], [0, 0, 1, 1], [], []>} : vector<8x128xf32>, vector<128x1024xf32>, vector<8x1024xf32> -> vector<8x1024xf32>
    %cst_14 = arith.constant 0.000000e+00 : f32
    %11 = vector.broadcast %cst_14 : f32 to vector<8x128xf32>
    %12 = vector.extract_strided_slice %10 {offsets = [0, 512], sizes = [8, 128], strides = [1, 1]} : vector<8x1024xf32> to vector<8x128xf32>
    %13 = vector.extract_strided_slice %10 {offsets = [0, 768], sizes = [8, 128], strides = [1, 1]} : vector<8x1024xf32> to vector<8x128xf32>
    %14 = arith.mulf %12, %3 : vector<8x128xf32>
    %c64_i32 = arith.constant 64 : i32
    %15 = tpu.dynamic_rotate %12 by %c64_i32 dim 1 : vector<8x128xf32>, i32 -> vector<8x128xf32>
    %16 = arith.mulf %15, %5 : vector<8x128xf32>
    %17 = arith.addf %14, %16 : vector<8x128xf32>
    %18 = vector.extract_strided_slice %10 {offsets = [0, 0], sizes = [8, 128], strides = [1, 1]} : vector<8x1024xf32> to vector<8x128xf32>
    %19 = arith.mulf %18, %3 : vector<8x128xf32>
    %c64_i32_15 = arith.constant 64 : i32
    %20 = tpu.dynamic_rotate %18 by %c64_i32_15 dim 1 : vector<8x128xf32>, i32 -> vector<8x128xf32>
    %21 = arith.mulf %20, %5 : vector<8x128xf32>
    %22 = arith.addf %19, %21 : vector<8x128xf32>
    %23 = vector.extract_strided_slice %10 {offsets = [0, 128], sizes = [8, 128], strides = [1, 1]} : vector<8x1024xf32> to vector<8x128xf32>
    %24 = arith.mulf %23, %3 : vector<8x128xf32>
    %c64_i32_16 = arith.constant 64 : i32
    %25 = tpu.dynamic_rotate %23 by %c64_i32_16 dim 1 : vector<8x128xf32>, i32 -> vector<8x128xf32>
    %26 = arith.mulf %25, %5 : vector<8x128xf32>
    %27 = arith.addf %24, %26 : vector<8x128xf32>
    %28 = tpu.concatenate %22, %27 in 0 : vector<8x128xf32>, vector<8x128xf32> -> vector<16x128xf32>
    %cst_17 = arith.constant dense<0.000000e+00> : vector<16x8xf32>
    %29 = tpu.matmul %28, %17, %cst_17 {dimension_numbers = #tpu.dot_dimension_numbers<[1], [1], [0], [0], [0, 0, 1, 0], [], []>} : vector<16x128xf32>, vector<8x128xf32>, vector<16x8xf32> -> vector<16x8xf32>
    %30 = arith.addf %29, %8 : vector<16x8xf32>
    %cst_18 = arith.constant dense<0xFF800000> : vector<16xf32>
    %31 = vector.multi_reduction <maximumf>, %30, %cst_18 [1] : vector<16x8xf32> to vector<16xf32>
    %32 = vector.shape_cast %31 : vector<16xf32> to vector<16x1xf32>
    %33 = vector.broadcast %32 : vector<16x1xf32> to vector<16x8xf32>
    %34 = arith.subf %30, %33 : vector<16x8xf32>
    %35 = math.exp %34 : vector<16x8xf32>
    %cst_19 = arith.constant dense<0.000000e+00> : vector<16xf32>
    %36 = vector.multi_reduction <add>, %35, %cst_19 [1] : vector<16x8xf32> to vector<16xf32>
    %37 = vector.shape_cast %36 : vector<16xf32> to vector<16x1xf32>
    %38 = tpu.reciprocal %37 : vector<16x1xf32> -> vector<16x1xf32>
    %cst_20 = arith.constant dense<0.000000e+00> : vector<16x128xf32>
    %39 = tpu.matmul %35, %13, %cst_20 {dimension_numbers = #tpu.dot_dimension_numbers<[1], [0], [0], [1], [0, 0, 1, 1], [], []>} : vector<16x8xf32>, vector<8x128xf32>, vector<16x128xf32> -> vector<16x128xf32>
    %40 = vector.broadcast %38 : vector<16x1xf32> to vector<16x128xf32>
    %41 = arith.mulf %39, %40 : vector<16x128xf32>
    %42 = vector.extract_strided_slice %35 {offsets = [0, 0], sizes = [8, 8], strides = [1, 1]} : vector<16x8xf32> to vector<8x8xf32>
    %43 = vector.extract_strided_slice %38 {offsets = [0, 0], sizes = [8, 1], strides = [1, 1]} : vector<16x1xf32> to vector<8x1xf32>
    %44 = vector.broadcast %43 : vector<8x1xf32> to vector<8x8xf32>
    %45 = arith.mulf %42, %44 : vector<8x8xf32>
    %c0_21 = arith.constant 0 : index
    %c0_22 = arith.constant 0 : index
    %c0_23 = arith.constant 0 : index
    %c0_24 = arith.constant 0 : index
    %46 = vector.load %arg8[%c0_21, %c0_22, %c0_23, %c0_24] : memref<1x4x8x8xf32, #tpu.memory_space<vmem>>, vector<1x1x8x8xf32>
    %47 = vector.shape_cast %46 : vector<1x1x8x8xf32> to vector<8x8xf32>
    %48 = vector.shape_cast %45 : vector<8x8xf32> to vector<1x1x8x8xf32>
    tpu.vector_store %arg8[%c0_21, %c0_22, %c0_23, %c0_24], %48 {strides = array<i32>} : memref<1x4x8x8xf32, #tpu.memory_space<vmem>>, vector<1x1x8x8xf32>,
    %49 = vector.extract_strided_slice %41 {offsets = [0, 0], sizes = [8, 128], strides = [1, 1]} : vector<16x128xf32> to vector<8x128xf32>
    %c0_25 = arith.constant 0 : index
    %c0_26 = arith.constant 0 : index
    %50 = vector.load %arg3[%c0_25, %c0_26] : memref<512x128xf32, #tpu.memory_space<vmem>>, vector<128x128xf32>
    %cst_27 = arith.constant dense<0.000000e+00> : vector<8x128xf32>
    %51 = tpu.matmul %49, %50, %cst_27 {dimension_numbers = #tpu.dot_dimension_numbers<[1], [0], [0], [1], [0, 0, 1, 1], [], []>} : vector<8x128xf32>, vector<128x128xf32>, vector<8x128xf32> -> vector<8x128xf32>
    %52 = arith.addf %11, %51 : vector<8x128xf32>
    %53 = vector.extract_strided_slice %35 {offsets = [8, 0], sizes = [8, 8], strides = [1, 1]} : vector<16x8xf32> to vector<8x8xf32>
    %54 = vector.extract_strided_slice %38 {offsets = [8, 0], sizes = [8, 1], strides = [1, 1]} : vector<16x1xf32> to vector<8x1xf32>
    %55 = vector.broadcast %54 : vector<8x1xf32> to vector<8x8xf32>
    %56 = arith.mulf %53, %55 : vector<8x8xf32>
    %c0_28 = arith.constant 0 : index
    %c1 = arith.constant 1 : index
    %c0_29 = arith.constant 0 : index
    %c0_30 = arith.constant 0 : index
    %57 = vector.load %arg8[%c0_28, %c1, %c0_29, %c0_30] : memref<1x4x8x8xf32, #tpu.memory_space<vmem>>, vector<1x1x8x8xf32>
    %58 = vector.shape_cast %57 : vector<1x1x8x8xf32> to vector<8x8xf32>
    %59 = vector.shape_cast %56 : vector<8x8xf32> to vector<1x1x8x8xf32>
    tpu.vector_store %arg8[%c0_28, %c1, %c0_29, %c0_30], %59 {strides = array<i32>} : memref<1x4x8x8xf32, #tpu.memory_space<vmem>>, vector<1x1x8x8xf32>,
    %60 = vector.extract_strided_slice %41 {offsets = [8, 0], sizes = [8, 128], strides = [1, 1]} : vector<16x128xf32> to vector<8x128xf32>
    %c128 = arith.constant 128 : index
    %c0_31 = arith.constant 0 : index
    %61 = vector.load %arg3[%c128, %c0_31] : memref<512x128xf32, #tpu.memory_space<vmem>>, vector<128x128xf32>
    %cst_32 = arith.constant dense<0.000000e+00> : vector<8x128xf32>
    %62 = tpu.matmul %60, %61, %cst_32 {dimension_numbers = #tpu.dot_dimension_numbers<[1], [0], [0], [1], [0, 0, 1, 1], [], []>} : vector<8x128xf32>, vector<128x128xf32>, vector<8x128xf32> -> vector<8x128xf32>
    %63 = arith.addf %52, %62 : vector<8x128xf32>
    %64 = vector.extract_strided_slice %10 {offsets = [0, 640], sizes = [8, 128], strides = [1, 1]} : vector<8x1024xf32> to vector<8x128xf32>
    %65 = vector.extract_strided_slice %10 {offsets = [0, 896], sizes = [8, 128], strides = [1, 1]} : vector<8x1024xf32> to vector<8x128xf32>
    %66 = arith.mulf %64, %3 : vector<8x128xf32>
    %c64_i32_33 = arith.constant 64 : i32
    %67 = tpu.dynamic_rotate %64 by %c64_i32_33 dim 1 : vector<8x128xf32>, i32 -> vector<8x128xf32>
    %68 = arith.mulf %67, %5 : vector<8x128xf32>
    %69 = arith.addf %66, %68 : vector<8x128xf32>
    %70 = vector.extract_strided_slice %10 {offsets = [0, 256], sizes = [8, 128], strides = [1, 1]} : vector<8x1024xf32> to vector<8x128xf32>
    %71 = arith.mulf %70, %3 : vector<8x128xf32>
    %c64_i32_34 = arith.constant 64 : i32
    %72 = tpu.dynamic_rotate %70 by %c64_i32_34 dim 1 : vector<8x128xf32>, i32 -> vector<8x128xf32>
    %73 = arith.mulf %72, %5 : vector<8x128xf32>
    %74 = arith.addf %71, %73 : vector<8x128xf32>
    %75 = vector.extract_strided_slice %10 {offsets = [0, 384], sizes = [8, 128], strides = [1, 1]} : vector<8x1024xf32> to vector<8x128xf32>
    %76 = arith.mulf %75, %3 : vector<8x128xf32>
    %c64_i32_35 = arith.constant 64 : i32
    %77 = tpu.dynamic_rotate %75 by %c64_i32_35 dim 1 : vector<8x128xf32>, i32 -> vector<8x128xf32>
    %78 = arith.mulf %77, %5 : vector<8x128xf32>
    %79 = arith.addf %76, %78 : vector<8x128xf32>
    %80 = tpu.concatenate %74, %79 in 0 : vector<8x128xf32>, vector<8x128xf32> -> vector<16x128xf32>
    %cst_36 = arith.constant dense<0.000000e+00> : vector<16x8xf32>
    %81 = tpu.matmul %80, %69, %cst_36 {dimension_numbers = #tpu.dot_dimension_numbers<[1], [1], [0], [0], [0, 0, 1, 0], [], []>} : vector<16x128xf32>, vector<8x128xf32>, vector<16x8xf32> -> vector<16x8xf32>
    %82 = arith.addf %81, %8 : vector<16x8xf32>
    %cst_37 = arith.constant dense<0xFF800000> : vector<16xf32>
    %83 = vector.multi_reduction <maximumf>, %82, %cst_37 [1] : vector<16x8xf32> to vector<16xf32>
    %84 = vector.shape_cast %83 : vector<16xf32> to vector<16x1xf32>
    %85 = vector.broadcast %84 : vector<16x1xf32> to vector<16x8xf32>
    %86 = arith.subf %82, %85 : vector<16x8xf32>
    %87 = math.exp %86 : vector<16x8xf32>
    %cst_38 = arith.constant dense<0.000000e+00> : vector<16xf32>
    %88 = vector.multi_reduction <add>, %87, %cst_38 [1] : vector<16x8xf32> to vector<16xf32>
    %89 = vector.shape_cast %88 : vector<16xf32> to vector<16x1xf32>
    %90 = tpu.reciprocal %89 : vector<16x1xf32> -> vector<16x1xf32>
    %cst_39 = arith.constant dense<0.000000e+00> : vector<16x128xf32>
    %91 = tpu.matmul %87, %65, %cst_39 {dimension_numbers = #tpu.dot_dimension_numbers<[1], [0], [0], [1], [0, 0, 1, 1], [], []>} : vector<16x8xf32>, vector<8x128xf32>, vector<16x128xf32> -> vector<16x128xf32>
    %92 = vector.broadcast %90 : vector<16x1xf32> to vector<16x128xf32>
    %93 = arith.mulf %91, %92 : vector<16x128xf32>
    %94 = vector.extract_strided_slice %87 {offsets = [0, 0], sizes = [8, 8], strides = [1, 1]} : vector<16x8xf32> to vector<8x8xf32>
    %95 = vector.extract_strided_slice %90 {offsets = [0, 0], sizes = [8, 1], strides = [1, 1]} : vector<16x1xf32> to vector<8x1xf32>
    %96 = vector.broadcast %95 : vector<8x1xf32> to vector<8x8xf32>
    %97 = arith.mulf %94, %96 : vector<8x8xf32>
    %c0_40 = arith.constant 0 : index
    %c2 = arith.constant 2 : index
    %c0_41 = arith.constant 0 : index
    %c0_42 = arith.constant 0 : index
    %98 = vector.load %arg8[%c0_40, %c2, %c0_41, %c0_42] : memref<1x4x8x8xf32, #tpu.memory_space<vmem>>, vector<1x1x8x8xf32>
    %99 = vector.shape_cast %98 : vector<1x1x8x8xf32> to vector<8x8xf32>
    %100 = vector.shape_cast %97 : vector<8x8xf32> to vector<1x1x8x8xf32>
    tpu.vector_store %arg8[%c0_40, %c2, %c0_41, %c0_42], %100 {strides = array<i32>} : memref<1x4x8x8xf32, #tpu.memory_space<vmem>>, vector<1x1x8x8xf32>,
    %101 = vector.extract_strided_slice %93 {offsets = [0, 0], sizes = [8, 128], strides = [1, 1]} : vector<16x128xf32> to vector<8x128xf32>
    %c256 = arith.constant 256 : index
    %c0_43 = arith.constant 0 : index
    %102 = vector.load %arg3[%c256, %c0_43] : memref<512x128xf32, #tpu.memory_space<vmem>>, vector<128x128xf32>
    %cst_44 = arith.constant dense<0.000000e+00> : vector<8x128xf32>
    %103 = tpu.matmul %101, %102, %cst_44 {dimension_numbers = #tpu.dot_dimension_numbers<[1], [0], [0], [1], [0, 0, 1, 1], [], []>} : vector<8x128xf32>, vector<128x128xf32>, vector<8x128xf32> -> vector<8x128xf32>
    %104 = arith.addf %63, %103 : vector<8x128xf32>
    %105 = vector.extract_strided_slice %87 {offsets = [8, 0], sizes = [8, 8], strides = [1, 1]} : vector<16x8xf32> to vector<8x8xf32>
    %106 = vector.extract_strided_slice %90 {offsets = [8, 0], sizes = [8, 1], strides = [1, 1]} : vector<16x1xf32> to vector<8x1xf32>
    %107 = vector.broadcast %106 : vector<8x1xf32> to vector<8x8xf32>
    %108 = arith.mulf %105, %107 : vector<8x8xf32>
    %c0_45 = arith.constant 0 : index
    %c3 = arith.constant 3 : index
    %c0_46 = arith.constant 0 : index
    %c0_47 = arith.constant 0 : index
    %109 = vector.load %arg8[%c0_45, %c3, %c0_46, %c0_47] : memref<1x4x8x8xf32, #tpu.memory_space<vmem>>, vector<1x1x8x8xf32>
    %110 = vector.shape_cast %109 : vector<1x1x8x8xf32> to vector<8x8xf32>
    %111 = vector.shape_cast %108 : vector<8x8xf32> to vector<1x1x8x8xf32>
    tpu.vector_store %arg8[%c0_45, %c3, %c0_46, %c0_47], %111 {strides = array<i32>} : memref<1x4x8x8xf32, #tpu.memory_space<vmem>>, vector<1x1x8x8xf32>,
    %112 = vector.extract_strided_slice %93 {offsets = [8, 0], sizes = [8, 128], strides = [1, 1]} : vector<16x128xf32> to vector<8x128xf32>
    %c384 = arith.constant 384 : index
    %c0_48 = arith.constant 0 : index
    %113 = vector.load %arg3[%c384, %c0_48] : memref<512x128xf32, #tpu.memory_space<vmem>>, vector<128x128xf32>
    %cst_49 = arith.constant dense<0.000000e+00> : vector<8x128xf32>
    %114 = tpu.matmul %112, %113, %cst_49 {dimension_numbers = #tpu.dot_dimension_numbers<[1], [0], [0], [1], [0, 0, 1, 1], [], []>} : vector<8x128xf32>, vector<128x128xf32>, vector<8x128xf32> -> vector<8x128xf32>
    %115 = arith.addf %104, %114 : vector<8x128xf32>
    %c0_50 = arith.constant 0 : index
    %c0_51 = arith.constant 0 : index
    %c0_52 = arith.constant 0 : index
    %116 = vector.load %arg7[%c0_50, %c0_51, %c0_52] : memref<1x8x128xf32, #tpu.memory_space<vmem>>, vector<1x8x128xf32>
    %117 = vector.shape_cast %116 : vector<1x8x128xf32> to vector<8x128xf32>
    %118 = vector.shape_cast %115 : vector<8x128xf32> to vector<1x8x128xf32>
    tpu.vector_store %arg7[%c0_50, %c0_51, %c0_52], %118 {strides = array<i32>} : memref<1x8x128xf32, #tpu.memory_space<vmem>>, vector<1x8x128xf32>,
    return
  }
  func.func @transform_0(%arg0: i32) -> (i32, i32, i32) {
    %c0_i32 = arith.constant 0 : i32
    %c0_i32_0 = arith.constant 0 : i32
    %c0_i32_1 = arith.constant 0 : i32
    return %arg0, %c0_i32, %c0_i32_0 : i32, i32, i32
  }
  func.func @transform_1(%arg0: i32) -> (i32, i32) {
    %c0_i32 = arith.constant 0 : i32
    %c0_i32_0 = arith.constant 0 : i32
    %c0_i32_1 = arith.constant 0 : i32
    return %c0_i32, %c0_i32_0 : i32, i32
  }
  func.func @transform_2(%arg0: i32) -> (i32, i32) {
    %c0_i32 = arith.constant 0 : i32
    %c0_i32_0 = arith.constant 0 : i32
    %c0_i32_1 = arith.constant 0 : i32
    return %c0_i32, %c0_i32_0 : i32, i32
  }
  func.func @transform_3(%arg0: i32) -> (i32, i32, i32) {
    %c0_i32 = arith.constant 0 : i32
    %c0_i32_0 = arith.constant 0 : i32
    %c0_i32_1 = arith.constant 0 : i32
    return %arg0, %c0_i32, %c0_i32_0 : i32, i32, i32
  }
  func.func @transform_4(%arg0: i32) -> (i32, i32, i32) {
    %c0_i32 = arith.constant 0 : i32
    %c0_i32_0 = arith.constant 0 : i32
    %c0_i32_1 = arith.constant 0 : i32
    return %arg0, %c0_i32, %c0_i32_0 : i32, i32, i32
  }
  func.func @transform_5(%arg0: i32) -> (i32, i32, i32, i32) {
    %c0_i32 = arith.constant 0 : i32
    %c0_i32_0 = arith.constant 0 : i32
    %c0_i32_1 = arith.constant 0 : i32
    %c0_i32_2 = arith.constant 0 : i32
    return %arg0, %c0_i32, %c0_i32_0, %c0_i32_1 : i32, i32, i32, i32
  }
  func.func @transform_6(%arg0: i32) -> (i32, i32, i32) {
    %c0_i32 = arith.constant 0 : i32
    %c0_i32_0 = arith.constant 0 : i32
    %c0_i32_1 = arith.constant 0 : i32
    return %arg0, %c0_i32, %c0_i32_0 : i32, i32, i32
  }
  func.func @transform_7(%arg0: i32) -> (i32, i32, i32, i32) {
    %c0_i32 = arith.constant 0 : i32
    %c0_i32_0 = arith.constant 0 : i32
    %c0_i32_1 = arith.constant 0 : i32
    %c0_i32_2 = arith.constant 0 : i32
    return %arg0, %c0_i32, %c0_i32_0, %c0_i32_1 : i32, i32, i32, i32
  }
}

</mosaic_0001>

<bundles_post_ra>
// kernel: tpu_custom_call.1
= control target key start
LH: loop header
LB: loop body
LE: loop exit
PB: predicated region body
PF: predicated region fallthrough
CT: control target
= control target key end

     0   :  { %s3032_s0 = inlined_call_operand.hbm [shape: f32[2,8,128], index: 0, kind: input, shape index: {}]   ;;  %s3033_s1 = inlined_call_operand.hbm [shape: f32[128,1024], index: 1, kind: input, shape index: {}]   ;;  %s3034_s2 = inlined_call_operand.hbm [shape: f32[512,128], index: 2, kind: input, shape index: {}]   ;;  %s3035_s3 = inlined_call_operand.hbm [shape: f32[2,8,128], index: 3, kind: input, shape index: {}]   ;;  %s3036_s4 = inlined_call_operand.hbm [shape: f32[2,8,128], index: 4, kind: input, shape index: {}]   ;;  %s3037_s5 = inlined_call_operand.hbm [shape: f32[2,1,8,8], index: 5, kind: input, shape index: {}]   ;;  %s3038_s6 = inlined_call_operand.hbm [shape: f32[2,8,128], index: 6, kind: output, shape index: {0}]   ;;  %s3039_s7 = inlined_call_operand.hbm [shape: f32[2,4,8,8], index: 7, kind: output, shape index: {1}]  }
   0x1   :  { %3053 = sst [smem:[#allocation28_spill]] %s3032_s0 }
   0x2   :  { %3054 = sst [smem:[#allocation29_spill]] %s3033_s1 }
   0x3   :  { %13 = vsyncpa [#allocation3], 0 }
   0x4   :  { %15 = vsyncpa [#allocation3 + $0x1], 0 }
   0x5   :  { %16 = vsyncpa [#allocation6], 0 }
   0x6   :  { %17 = vsyncpa [#allocation9], 0 }
   0x7   :  { %19 = vsyncpa [#allocation9 + $0x1], 0 }
   0x8   :  { %20 = vsyncpa [#allocation12], 0 }
   0x9   :  { %22 = vsyncpa [#allocation12 + $0x1], 0 }
   0xa   :  { %23 = vsyncpa [#allocation4], 0 }
   0xb   :  { %25 = vsyncpa [#allocation4 + $0x1], 0 }
   0xc   :  { %26 = vsyncpa [#allocation15], 0 }
   0xd   :  { %28 = vsyncpa [#allocation15 + $0x1], 0  ;;  %s2543_s24 = smov 0   ;;  %s2545_s25 = smov 0  }
   0xe   :  { %s2547_s26 = smov 0   ;;  %s2549_s27 = smov 0  }
   0xf LB: > { %3055 = sst [smem:[#allocation22_spill]] %s2472_s24  ;;  %s2564_s28 = sadd.s32 4294967295, %s2484_s27   ;;  %s2484_s27 = sphi %s2549_s27, %s3082_s27   ;;  %s2480_s26 = sphi %s2547_s26, %s3084_s26   ;;  %s2476_s25 = sphi %s2545_s25, %s3086_s25   ;;  %s2472_s24 = sphi %s2543_s24, %s3085_s24  }
  0x10   : > { %3056 = sst [smem:[#allocation23_spill]] %s2480_s26  ;;  %s1825_s29 = sadd.s32 4294967294, %s2484_s27  }
  0x11   : > { %3057 = sst [smem:[#allocation24_spill]] %s2484_s27  ;;  %p54_p0 = scmp.ne.s32.totalorder %s2476_s25, %s2472_s24 }
  0x12   : > { %p3043_p1 = scmp.eq.s32.totalorder %s2564_s28, 0  ;;  %p198_p2 = scmp.eq.s32.totalorder %s2564_s28, 1 }
  0x13   : > { %p204_p3 = scmp.eq.s32.totalorder %s1825_s29, 1  ;;  %p1826_p5 = scmp.ge.s32.totalorder %s2484_s27, 1 }
  0x14   : > { %p2573_p4 = por %p3043_p1, %p54_p0  ;;  %p237_p7 = scmp.lt.s32.totalorder %s2484_s27, 3 }
  0x15   : > { %p2578_p6 = por %p204_p3, %p54_p0  ;;  %s2486_s10 = smov [#allocation5]  }
  0x16   : > { %s3058_s30 = scalar_select %p2573_p4, 1, 0 }
  0x17   : > { %s3059_s8 = scalar_select %p2578_p6, 1, 0 }
  0x18   : > { %p2583_p8 = pnand %p1826_p5, %p237_p7  ;;  %s249_s11 = sshll.u32 %s2486_s10, 4  ;;  %s250_s11 = int_to_ptr.vmem [resolvable:$true] %s249_s11 }
  0x19   : > { %3060 = sst [smem:[#allocation25_spill]] %s3059_s8  ;;  %s2597_s13 = sadd.s32 1, %s2484_s27  }
  0x1a   : > { %s3061_s9 = scalar_select %p2583_p8, 1, 0 }
  0x1b   : > { %p2122_p9 = pneg %p2583_p8  ;;  %3063 = sst [smem:[#allocation26_spill]] %s2597_s13 }
  0x1c   : > { %s41_s14 = sadd.s32 1, %s2480_s26  ;;  %s38_s15 = ssub.s32 %s2484_s27, %s2597_s13 }
  0x1d   : > { %p2592_p11 = pnand %p2122_p9, %p3043_p1  ;;  %s2225_s16 = scalar_lea.vmem %s250_s11, 16384 }
  0x1e   : > { %p2226_p13 = scmp.ne.s32.totalorder %s250_s11, %s2225_s16  ;;  %p2233_p5 = scmp.lt.s32.totalorder %s250_s11, %s250_s11 }
  0x1f   : > { %s3062_s12 = scalar_select %p2592_p11, 1, 0 }
  0x20   : > { %p3044_p12 = pneg %p2592_p11  ;;  %p2234_p7 = scmp.lt.s32.totalorder %s2225_s16, %s2225_s16 }
  0x22   : > { %p2228_p0 = pnand %p2226_p13, %p3044_p12  ;;  %p2235_p9 = por %p2234_p7, %p2233_p5 }
  0x24   : > { %p2229_p3 = pneg %p2228_p0 }
  0x26   : > { %p2236_p10 = pnand %p2235_p9, %p2229_p3 }
  0x28   : > { %2239 = shalt.err (!%p2236_p10)
}
  0x29   : > { %s2487_s17 = smov 1024   ;;  %s2488_s18 = smov 64  }
  0x2a   : > { %s3064_s1 = sld [smem:[#allocation29_spill]]  ;;  %p39_p13 = scmp.eq.s32.totalorder %s38_s15, 0 }
  0x2b   : > { %p48_p0 = scmp.ne.s32.totalorder %s2480_s26, %s2476_s25  ;;  %p49_p10 = scmp.eq.s32.totalorder %s2484_s27, 0 }
  0x2c   : > { %p2151_p3 = scmp.lt.s32.totalorder %s2484_s27, 2  ;;  %s2626_s23 = sand.u32 1, %s2480_s26  }
  0x2d   : > { %s2617_s21 = scalar_select %p39_p13, %s2480_s26, %s41_s14  }
  0x2e   : > { %p50_p5 = por %p49_p10, %p48_p0  ;;  %p2621_p7 = por %p198_p2, %p48_p0 }
  0x2f   : > { %3065 = sst [smem:[#allocation27_spill]] %s2617_s21  ;;  %s2629_s29 = sshll.u32 %s2484_s27, 7 }
  0x30   : > { %2125 = dma.hbm_to_vmem [thread:$0]  (!%p2592_p11), %s3064_s1, 16384, %s250_s11, [#allocation6], %s2487_s17, %s2487_s17, %s2488_s18  }
  0x31   : > { %s3066_s22 = scalar_select %p2621_p7, 1, 0 }
  0x32   : > { %s2632_s10 = sshll.u32 %s2626_s23, 3  ;;  %p2634_p9 = pnand %p2151_p3, %p50_p5 }
  0x33   : > { %s294_s14 = sand.u32 1, %s2484_s27   ;;  %s2643_s17 = scalar_lea.hbm %s3035_s3, %s2629_s29 }
  0x34   : > { %s298_s18 = scalar_lea.vmem [#allocation8], %s2632_s10  ;;  %s2646_s20 = scalar_lea.sflag [#allocation9], %s294_s14 }
  0x35   : > { %s305_s19 = sshll.u32 %s298_s18, 4  ;;  %s2240_s1 = scalar_lea.hbm %s2643_s17, 128  ;;  %s306_s19 = int_to_ptr.vmem [resolvable:$true] %s305_s19 }
  0x36   : > { %p2241_p2 = scmp.ne.s32.totalorder %s2643_s17, %s2240_s1  ;;  %p2652_p13 = pneg %p2634_p9 }
  0x37   : > { %s2245_s26 = scalar_lea.hbm %s3035_s3, 256  ;;  %p2246_p3 = scmp.lt.s32.totalorder %s2643_s17, %s3035_s3 }
  0x38   : > { %p2243_p0 = pnand %p2652_p13, %p2241_p2  ;;  %p2247_p5 = scmp.lt.s32.totalorder %s2245_s26, %s2240_s1 }
  0x3a   : > { %p2244_p10 = pneg %p2243_p0  ;;  %p2248_p1 = por %p2247_p5, %p2246_p3 }
  0x3c   : > { %p2249_p12 = pnand %p2248_p1, %p2244_p10 }
  0x3e   : > { %2252 = shalt.err (!%p2249_p12)
}
  0x3f   : > { %s2253_s14 = scalar_lea.vmem %s306_s19, 128  ;;  %s2489_s27 = smov [#allocation8]  }
  0x40   : > { %p2254_p6 = scmp.ne.s32.totalorder %s306_s19, %s2253_s14  ;;  %s2258_s8 = sshll.u32 %s2489_s27, 4  ;;  %s2259_s8 = int_to_ptr.vmem [resolvable:$false] %s2258_s8 }
  0x41   : > { %s2260_s24 = scalar_lea.vmem %s2259_s8, 256  ;;  %p2261_p2 = scmp.lt.s32.totalorder %s306_s19, %s2259_s8 }
  0x42   : > { %p2256_p7 = pnand %p2254_p6, %p2652_p13  ;;  %p2262_p0 = scmp.lt.s32.totalorder %s2260_s24, %s2253_s14 }
  0x44   : > { %p2257_p4 = pneg %p2256_p7  ;;  %p2263_p8 = por %p2262_p0, %p2261_p2 }
  0x46   : > { %p2264_p11 = pnand %p2263_p8, %p2257_p4 }
  0x48   : > { %2267 = shalt.err (!%p2264_p11)
}
  0x49   : > { %2135 = dma.hbm_to_vmem [thread:$0]  (!%p2634_p9), %s2643_s17, 128, %s306_s19, %s2646_s20  }
  0x4a   : > { %s2490_s1 = smov [#allocation7]   ;;  %p3069_p6 = scmp.ne.s32.totalorder %s3062_s12, 0 }
  0x4b   : > { %s262_s26 = sshll.u32 %s2490_s1, 4  ;;  %s263_s26 = int_to_ptr.vmem [resolvable:$true] %s262_s26 }
  0x4c   : > { %s2279_s13 = scalar_lea.vmem %s263_s26, 8192  ;;  %p3070_p12 = pneg %p3069_p6 }
  0x4d   : > { %p2280_p1 = scmp.ne.s32.totalorder %s263_s26, %s2279_s13  ;;  %p2287_p3 = scmp.lt.s32.totalorder %s263_s26, %s263_s26 }
  0x4e   : > { %p2288_p5 = scmp.lt.s32.totalorder %s2279_s13, %s2279_s13 }
  0x4f   : > { %p2282_p7 = pnand %p2280_p1, %p3070_p12 }
  0x50   : > { %p2289_p2 = por %p2288_p5, %p2287_p3 }
  0x51   : > { %p2283_p10 = pneg %p2282_p7 }
  0x53   : > { %p2290_p4 = pnand %p2289_p2, %p2283_p10 }
  0x55   : > { %2293 = shalt.err (!%p2290_p4)
}
  0x56   : > { %s2491_s24 = smov 128   ;;  %s2492_s27 = smov 8  }
  0x57   : > { %2128 = dma.hbm_to_vmem [thread:$0]  (!%p3069_p6), %s3034_s2, 8192, %s263_s26, [#allocation6], %s2491_s24, %s2491_s24, %s2492_s27  }
  0x58   : > { %s3071_s0 = sld [smem:[#allocation28_spill]]  ;;  %s280_s18 = scalar_lea.vmem [#allocation2], %s2632_s10 }
  0x59   : > { %s287_s14 = sshll.u32 %s280_s18, 4  ;;  %s277_s1 = scalar_lea.sflag [#allocation3], %s2626_s23  ;;  %s288_s14 = int_to_ptr.vmem [resolvable:$true] %s287_s14 }
  0x5e   : > { %s2683_s16 = scalar_lea.hbm %s3071_s0, %s2629_s29  ;;  %s2299_s26 = scalar_lea.hbm %s3071_s0, 256 }
  0x5f   : > { %s2294_s13 = scalar_lea.hbm %s2683_s16, 128  ;;  %p2300_p1 = scmp.lt.s32.totalorder %s2683_s16, %s3071_s0 }
  0x60   : > { %p2295_p8 = scmp.ne.s32.totalorder %s2683_s16, %s2294_s13  ;;  %p2301_p6 = scmp.lt.s32.totalorder %s2299_s26, %s2294_s13 }
  0x62   : > { %p2297_p11 = pnand %p2295_p8, %p2652_p13  ;;  %p2302_p12 = por %p2301_p6, %p2300_p1 }
  0x64   : > { %p2298_p0 = pneg %p2297_p11 }
  0x66   : > { %p2303_p7 = pnand %p2302_p12, %p2298_p0 }
  0x68   : > { %2306 = shalt.err (!%p2303_p7)
}
  0x69   : > { %s2307_s17 = scalar_lea.vmem %s288_s14, 128  ;;  %s2493_s19 = smov [#allocation2]  }
  0x6a   : > { %p2308_p10 = scmp.ne.s32.totalorder %s288_s14, %s2307_s17  ;;  %s2312_s15 = sshll.u32 %s2493_s19, 4  ;;  %s2313_s15 = int_to_ptr.vmem [resolvable:$false] %s2312_s15 }
  0x6b   : > { %s2314_s18 = scalar_lea.vmem %s2313_s15, 256  ;;  %p2315_p2 = scmp.lt.s32.totalorder %s288_s14, %s2313_s15 }
  0x6c   : > { %p2310_p3 = pnand %p2308_p10, %p2652_p13  ;;  %p2316_p4 = scmp.lt.s32.totalorder %s2314_s18, %s2307_s17 }
  0x6e   : > { %p2311_p5 = pneg %p2310_p3  ;;  %p2317_p8 = por %p2316_p4, %p2315_p2 }
  0x70   : > { %p2318_p11 = pnand %p2317_p8, %p2311_p5 }
  0x72   : > { %2321 = shalt.err (!%p2318_p11)
}
  0x73   : > { %2132 = dma.hbm_to_vmem [thread:$0]  (!%p2634_p9), %s2683_s16, 128, %s288_s14, %s277_s1  }
  0x74   : > { %s321_s8 = scalar_lea.hbm %s3036_s4, %s2629_s29  ;;  %s316_s26 = scalar_lea.vmem [#allocation10], %s2632_s10 }
  0x75   : > { %s323_s24 = sshll.u32 %s316_s26, 4  ;;  %s2322_s27 = scalar_lea.hbm %s321_s8, 128  ;;  %s324_s24 = int_to_ptr.vmem [resolvable:$true] %s323_s24 }
  0x76   : > { %p2323_p0 = scmp.ne.s32.totalorder %s321_s8, %s2322_s27  ;;  %s2327_s15 = scalar_lea.hbm %s3036_s4, 256 }
  0x77   : > { %p2328_p12 = scmp.lt.s32.totalorder %s321_s8, %s3036_s4  ;;  %p2329_p7 = scmp.lt.s32.totalorder %s2327_s15, %s2322_s27 }
  0x78   : > { %p2325_p1 = pnand %p2323_p0, %p2652_p13 }
  0x79   : > { %p2330_p10 = por %p2329_p7, %p2328_p12 }
  0x7a   : > { %p2326_p6 = pneg %p2325_p1 }
  0x7c   : > { %p2331_p3 = pnand %p2330_p10, %p2326_p6 }
  0x7e   : > { %2334 = shalt.err (!%p2331_p3)
}
  0x7f   : > { %s2335_s16 = scalar_lea.vmem %s324_s24, 128  ;;  %s2494_s14 = smov [#allocation10]  }
  0x80   : > { %p2336_p5 = scmp.ne.s32.totalorder %s324_s24, %s2335_s16  ;;  %s2340_s1 = sshll.u32 %s2494_s14, 4  ;;  %s2341_s1 = int_to_ptr.vmem [resolvable:$false] %s2340_s1 }
  0x81   : > { %s2342_s13 = scalar_lea.vmem %s2341_s1, 256  ;;  %p2343_p8 = scmp.lt.s32.totalorder %s324_s24, %s2341_s1 }
  0x82   : > { %p2338_p2 = pnand %p2336_p5, %p2652_p13  ;;  %p2344_p11 = scmp.lt.s32.totalorder %s2342_s13, %s2335_s16 }
  0x84   : > { %p2339_p4 = pneg %p2338_p2  ;;  %p2345_p0 = por %p2344_p11, %p2343_p8 }
  0x86   : > { %p2346_p1 = pnand %p2345_p0, %p2339_p4 }
  0x88   : > { %2349 = shalt.err (!%p2346_p1)
}
  0x89   : > { %2138 = dma.hbm_to_vmem [thread:$0]  (!%p2634_p9), %s321_s8, 128, %s324_s24, %s2646_s20  }
  0x8a   : > { %s2725_s26 = scalar_lea.hbm %s3037_s5, %s2629_s29  ;;  %s334_s27 = scalar_lea.vmem [#allocation11], %s2632_s10 }
  0x8b   : > { %s341_s17 = sshll.u32 %s334_s27, 4  ;;  %s331_s19 = scalar_lea.sflag [#allocation12], %s2626_s23  ;;  %s342_s17 = int_to_ptr.vmem [resolvable:$true] %s341_s17 }
  0x8c   : > { %s2350_s15 = scalar_lea.hbm %s2725_s26, 128  ;;  %s2355_s20 = scalar_lea.hbm %s3037_s5, 256 }
  0x8d   : > { %p2351_p6 = scmp.ne.s32.totalorder %s2725_s26, %s2350_s15  ;;  %p2356_p10 = scmp.lt.s32.totalorder %s2725_s26, %s3037_s5 }
  0x8e   : > { %p2357_p3 = scmp.lt.s32.totalorder %s2355_s20, %s2350_s15 }
  0x8f   : > { %p2353_p12 = pnand %p2351_p6, %p2652_p13 }
  0x90   : > { %p2358_p5 = por %p2357_p3, %p2356_p10 }
  0x91   : > { %p2354_p7 = pneg %p2353_p12 }
  0x93   : > { %p2359_p2 = pnand %p2358_p5, %p2354_p7 }
  0x95   : > { %2362 = shalt.err (!%p2359_p2)
}
  0x96   : > { %s2363_s29 = scalar_lea.vmem %s342_s17, 128  ;;  %s2495_s23 = smov [#allocation11]  }
  0x97   : > { %p2364_p4 = scmp.ne.s32.totalorder %s342_s17, %s2363_s29  ;;  %s2368_s10 = sshll.u32 %s2495_s23, 4  ;;  %s2369_s10 = int_to_ptr.vmem [resolvable:$false] %s2368_s10 }
  0x98   : > { %s2370_s14 = scalar_lea.vmem %s2369_s10, 256  ;;  %p2371_p0 = scmp.lt.s32.totalorder %s342_s17, %s2369_s10 }
  0x99   : > { %p2366_p8 = pnand %p2364_p4, %p2652_p13  ;;  %p2372_p1 = scmp.lt.s32.totalorder %s2370_s14, %s2363_s29 }
  0x9b   : > { %p2367_p11 = pneg %p2366_p8  ;;  %p2373_p6 = por %p2372_p1, %p2371_p0 }
  0x9d   : > { %p2374_p12 = pnand %p2373_p6, %p2367_p11 }
  0x9f   : > { %2377 = shalt.err (!%p2374_p12)
}
  0xa0   : > { %2141 = dma.hbm_to_vmem [thread:$0]  (!%p2634_p9), %s2725_s26, 128, %s342_s17, %s331_s19  }
  0xa1   : > { %p3072_p7 = scmp.ne.s32.totalorder %s3061_s9, 0 }
  0xa2   : > { %s2748_s21 = sand.u32 (!%p3072_p7), 1, %s2476_s25   ;;  %p3073_p13 = scmp.ne.s32.totalorder (!%p3072_p7), %s3058_s30, 0 }
  0xa3   : > { %350 = sbr.rel (%p3072_p7) target bundleno = 1880 (0x758), region = 44  ;;  %s2751_s1 = sshll.u32 (!%p3072_p7), %s2748_s21, 3 }
  0xa4   : > { %s353_s13 = scalar_lea.sflag (!%p3072_p7), [#allocation3], %s2748_s21  ;;  %s356_s0 = scalar_lea.vmem (!%p3072_p7), [#allocation2], %s2751_s1 }
  0xa8   : > { %2447 = dma.done.wait (%p3073_p13), %s353_s13, 128  }
  0xa9   : > { %2449 = vsyncadd (%p3073_p13), %s353_s13, 4294967168  ;;  %p3074_p9 = scmp.eq.s32.totalorder %s2564_s28, 0 }
  0xab   : > { %2451 = dma.done.wait (%p3074_p9), [#allocation6], 24576   ;;  %p3075_p10 = pmov %p3074_p9 }
  0xac   : > { %s369_s9 = sand.u32 1, %s2564_s28   ;;  %s373_s12 = scalar_lea.vmem [#allocation8], %s2751_s1 }
  0xad   : > { %2453 = vsyncadd (%p3075_p10), [#allocation6], 4294942720  ;;  %s370_s11 = scalar_lea.sflag [#allocation9], %s369_s9 }
  0xae   : > { %2455 = dma.done.wait (%p3073_p13), %s370_s11, 256  }
  0xaf   : > { %2457 = vsyncadd (%p3073_p13), %s370_s11, 4294967040  ;;  %s382_s26 = scalar_lea.vmem [#allocation10], %s2751_s1  ;;  %s388_s27 = scalar_lea.sflag [#allocation12], %s2748_s21 }
  0xb0   : > { %s391_s17 = scalar_lea.vmem [#allocation11], %s2751_s1 }
  0xb1   : > { %2459 = dma.done.wait (%p3073_p13), %s388_s27, 128  }
  0xb2   : > { %2461 = vsyncadd (%p3073_p13), %s388_s27, 4294967168  ;;  %v2496_v0 = vmov 0.0   ;;  %v567_v1 = vld [vmem:[#allocation5 + $0x3c8] sm:$0xff]  ;;  %v566_v2 = vld [vmem:[#allocation5 + $0x3c0] sm:$0xff]  ;;  %s2497_s30 = smov 64   ;;  %vm948_vm0 = vcmask 64512  }
  0xb3   : > { %638 = vmatprep.mubr.f32.mxu0 %v2496_v0  ;;  %709 = vmatprep.mubr.f32.mxu1 %v2496_v0  ;;  %v559_v3 = vld [vmem:[#allocation5 + $0x388] sm:$0xff]  ;;  %v558_v4 = vld [vmem:[#allocation5 + $0x380] sm:$0xff]  ;;  %v2780_v33 = vld [vmem:[%s356_s0] sm:$0xff]  ;;  %vm2498_vm1 = vmmov 0   ;;  %s1846_s19 = sshll.u32 %s2748_s21, 5  ;;  %s1861_s18 = sshll.u32 %s2564_s28, 9 }
  0xb4   : > { %574 = vmatprep.subr.mxu0 %v567_v1  ;;  %v551_v5 = vld [vmem:[#allocation5 + $0x348] sm:$0xff]  ;;  %v550_v6 = vld [vmem:[#allocation5 + $0x340] sm:$0xff]  ;;  %s2889_s15 = scalar_lea.vmem [#allocation14], %s1846_s19  ;;  %s2968_s24 = scalar_lea.hbm %s3039_s7, %s1861_s18 }
  0xb5   : > { %575 = vmatpush1.msra.mxu0 %v566_v2  ;;  %v543_v7 = vld [vmem:[#allocation5 + $0x308] sm:$0xff]  ;;  %v542_v8 = vld [vmem:[#allocation5 + $0x300] sm:$0xff]  ;;  %s1635_s16 = sshll.u32 %s2889_s15, 4  ;;  %s1609_s29 = scalar_lea.sflag [#allocation15], %s2748_s21  ;;  %s2970_s16 = int_to_ptr.vmem [resolvable:$true] %s1635_s16 }
  0xb6   : > { %576 = vmatprep.subr.mxu0 %v559_v3  ;;  %v535_v9 = vld [vmem:[#allocation5 + $0x2c8] sm:$0xff]  ;;  %v534_v10 = vld [vmem:[#allocation5 + $0x2c0] sm:$0xff]  ;;  %s2378_s23 = scalar_lea.vmem %s2970_s16, 512  ;;  %p3076_p5 = scmp.ne.s32.totalorder %s3066_s22, 0 }
  0xb7   : > { %577 = vmatpush1.msra.mxu0 %v558_v4  ;;  %v527_v11 = vld [vmem:[#allocation5 + $0x288] sm:$0xff]  ;;  %v526_v12 = vld [vmem:[#allocation5 + $0x280] sm:$0xff]  ;;  %p2379_p3 = scmp.ne.s32.totalorder %s2970_s16, %s2378_s23  ;;  %s2499_s10 = smov [#allocation14]  }
  0xb8   : > { %578 = vmatprep.subr.mxu0 %v551_v5  ;;  %v519_v13 = vld [vmem:[#allocation5 + $0x248] sm:$0xff]  ;;  %v518_v14 = vld [vmem:[#allocation5 + $0x240] sm:$0xff]  ;;  %v569_v5 = vld [vmem:[#allocation5 + $0x3d8] sm:$0xff]  ;;  %s2382_s14 = sshll.u32 %s2499_s10, 4  ;;  %s2383_s14 = int_to_ptr.vmem [resolvable:$false] %s2382_s14 }
  0xb9   : > { %579 = vmatpush1.msra.mxu0 %v550_v6  ;;  %v511_v15 = vld [vmem:[#allocation5 + $0x208] sm:$0xff]  ;;  %v510_v16 = vld [vmem:[#allocation5 + $0x200] sm:$0xff]  ;;  %v568_v6 = vld [vmem:[#allocation5 + $0x3d0] sm:$0xff]  ;;  %645 = vmatprep.subr.mxu1 %v569_v5  ;;  %p2380_p2 = pnand %p2379_p3, %p3076_p5  ;;  %s2384_s13 = scalar_lea.vmem %s2383_s14, 1024 }
  0xba   : > { %580 = vmatprep.subr.mxu0 %v543_v7  ;;  %v503_v17 = vld [vmem:[#allocation5 + $0x1c8] sm:$0xff]  ;;  %v502_v18 = vld [vmem:[#allocation5 + $0x1c0] sm:$0xff]  ;;  %v561_v7 = vld [vmem:[#allocation5 + $0x398] sm:$0xff]  ;;  %646 = vmatpush1.msra.mxu1 %v568_v6  ;;  %p2385_p8 = scmp.lt.s32.totalorder %s2970_s16, %s2383_s14  ;;  %p2386_p11 = scmp.lt.s32.totalorder %s2384_s13, %s2378_s23 }
  0xbb   : > { %581 = vmatpush1.msra.mxu0 %v542_v8  ;;  %v495_v19 = vld [vmem:[#allocation5 + $0x188] sm:$0xff]  ;;  %v494_v20 = vld [vmem:[#allocation5 + $0x180] sm:$0xff]  ;;  %v560_v8 = vld [vmem:[#allocation5 + $0x390] sm:$0xff]  ;;  %647 = vmatprep.subr.mxu1 %v561_v7  ;;  %p2381_p4 = pneg %p2380_p2 }
  0xbc   : > { %582 = vmatprep.subr.mxu0 %v535_v9  ;;  %v487_v21 = vld [vmem:[#allocation5 + $0x148] sm:$0xff]  ;;  %v486_v22 = vld [vmem:[#allocation5 + $0x140] sm:$0xff]  ;;  %v553_v9 = vld [vmem:[#allocation5 + $0x358] sm:$0xff]  ;;  %648 = vmatpush1.msra.mxu1 %v560_v8  ;;  %p2387_p0 = por %p2386_p11, %p2385_p8 }
  0xbd   : > { %583 = vmatpush1.msra.mxu0 %v534_v10  ;;  %v479_v23 = vld [vmem:[#allocation5 + $0x108] sm:$0xff]  ;;  %v478_v24 = vld [vmem:[#allocation5 + $0x100] sm:$0xff]  ;;  %649 = vmatprep.subr.mxu1 %v553_v9  ;;  %v468_v5 = vld [vmem:[#allocation5 + $0xb0] sm:$0xff] }
  0xbe   : > { %584 = vmatprep.subr.mxu0 %v527_v11  ;;  %v471_v25 = vld [vmem:[#allocation5 + $0xc8] sm:$0xff]  ;;  %v470_v26 = vld [vmem:[#allocation5 + $0xc0] sm:$0xff]  ;;  %v552_v11 = vld [vmem:[#allocation5 + $0x350] sm:$0xff]  ;;  %p2388_p1 = pnand %p2387_p0, %p2381_p4 }
  0xbf   : > { %585 = vmatpush1.msra.mxu0 %v526_v12  ;;  %v463_v27 = vld [vmem:[#allocation5 + $0x88] sm:$0xff]  ;;  %v462_v28 = vld [vmem:[#allocation5 + $0x80] sm:$0xff]  ;;  %v545_v12 = vld [vmem:[#allocation5 + $0x318] sm:$0xff]  ;;  %650 = vmatpush1.msra.mxu1 %v552_v11 }
  0xc0   : > { %586 = vmatprep.subr.mxu0 %v519_v13  ;;  %v455_v29 = vld [vmem:[#allocation5 + $0x48] sm:$0xff]  ;;  %v454_v30 = vld [vmem:[#allocation5 + $0x40] sm:$0xff]  ;;  %v544_v13 = vld [vmem:[#allocation5 + $0x310] sm:$0xff]  ;;  %651 = vmatprep.subr.mxu1 %v545_v12 }
  0xc1   : > { %587 = vmatpush1.msra.mxu0 %v518_v14  ;;  %v447_v31 = vld [vmem:[#allocation5 + $0x8] sm:$0xff]  ;;  %v446_v32 = vld [vmem:[#allocation5] sm:$0xff]  ;;  %v537_v14 = vld [vmem:[#allocation5 + $0x2d8] sm:$0xff]  ;;  %652 = vmatpush1.msra.mxu1 %v544_v13 }
  0xc2   : > { %588 = vmatprep.subr.mxu0 %v511_v15  ;;  %v571_v34 = vld [vmem:[#allocation5 + $0x3e8] sm:$0xff]  ;;  %v570_v35 = vld [vmem:[#allocation5 + $0x3e0] sm:$0xff]  ;;  %v536_v15 = vld [vmem:[#allocation5 + $0x2d0] sm:$0xff]  ;;  %653 = vmatprep.subr.mxu1 %v537_v14 }
  0xc3   : > { %589 = vmatpush1.msra.mxu0 %v510_v16  ;;  %v563_v36 = vld [vmem:[#allocation5 + $0x3a8] sm:$0xff]  ;;  %v562_v37 = vld [vmem:[#allocation5 + $0x3a0] sm:$0xff]  ;;  %v529_v16 = vld [vmem:[#allocation5 + $0x298] sm:$0xff]  ;;  %654 = vmatpush1.msra.mxu1 %v536_v15 }
  0xc4   : > { %590 = vmatprep.subr.mxu0 %v503_v17  ;;  %v555_v38 = vld [vmem:[#allocation5 + $0x368] sm:$0xff]  ;;  %v554_v39 = vld [vmem:[#allocation5 + $0x360] sm:$0xff]  ;;  %v528_v17 = vld [vmem:[#allocation5 + $0x290] sm:$0xff]  ;;  %655 = vmatprep.subr.mxu1 %v529_v16 }
  0xc5   : > { %591 = vmatpush1.msra.mxu0 %v502_v18  ;;  %v547_v40 = vld [vmem:[#allocation5 + $0x328] sm:$0xff]  ;;  %v546_v41 = vld [vmem:[#allocation5 + $0x320] sm:$0xff]  ;;  %v521_v18 = vld [vmem:[#allocation5 + $0x258] sm:$0xff]  ;;  %656 = vmatpush1.msra.mxu1 %v528_v17 }
  0xc6   : > { %592 = vmatprep.subr.mxu0 %v495_v19  ;;  %v539_v42 = vld [vmem:[#allocation5 + $0x2e8] sm:$0xff]  ;;  %v538_v43 = vld [vmem:[#allocation5 + $0x2e0] sm:$0xff]  ;;  %v520_v19 = vld [vmem:[#allocation5 + $0x250] sm:$0xff]  ;;  %657 = vmatprep.subr.mxu1 %v521_v18 }
  0xc7   : > { %593 = vmatpush1.msra.mxu0 %v494_v20  ;;  %v531_v44 = vld [vmem:[#allocation5 + $0x2a8] sm:$0xff]  ;;  %v530_v45 = vld [vmem:[#allocation5 + $0x2a0] sm:$0xff]  ;;  %v513_v20 = vld [vmem:[#allocation5 + $0x218] sm:$0xff]  ;;  %658 = vmatpush1.msra.mxu1 %v520_v19 }
  0xc8   : > { %594 = vmatprep.subr.mxu0 %v487_v21  ;;  %v523_v46 = vld [vmem:[#allocation5 + $0x268] sm:$0xff]  ;;  %v522_v47 = vld [vmem:[#allocation5 + $0x260] sm:$0xff]  ;;  %v512_v21 = vld [vmem:[#allocation5 + $0x210] sm:$0xff]  ;;  %659 = vmatprep.subr.mxu1 %v513_v20 }
  0xc9   : > { %595 = vmatpush1.msra.mxu0 %v486_v22  ;;  %v515_v48 = vld [vmem:[#allocation5 + $0x228] sm:$0xff]  ;;  %v514_v49 = vld [vmem:[#allocation5 + $0x220] sm:$0xff]  ;;  %v505_v22 = vld [vmem:[#allocation5 + $0x1d8] sm:$0xff]  ;;  %660 = vmatpush1.msra.mxu1 %v512_v21 }
  0xca   : > { %596 = vmatprep.subr.mxu0 %v479_v23  ;;  %v507_v50 = vld [vmem:[#allocation5 + $0x1e8] sm:$0xff]  ;;  %v506_v51 = vld [vmem:[#allocation5 + $0x1e0] sm:$0xff]  ;;  %v504_v23 = vld [vmem:[#allocation5 + $0x1d0] sm:$0xff]  ;;  %661 = vmatprep.subr.mxu1 %v505_v22 }
  0xcb   : > { %597 = vmatpush1.msra.mxu0 %v478_v24  ;;  %v499_v52 = vld [vmem:[#allocation5 + $0x1a8] sm:$0xff]  ;;  %v498_v53 = vld [vmem:[#allocation5 + $0x1a0] sm:$0xff]  ;;  %v497_v24 = vld [vmem:[#allocation5 + $0x198] sm:$0xff]  ;;  %662 = vmatpush1.msra.mxu1 %v504_v23 }
  0xcc   : > { %598 = vmatprep.subr.mxu0 %v471_v25  ;;  %v491_v54 = vld [vmem:[#allocation5 + $0x168] sm:$0xff]  ;;  %v490_v55 = vld [vmem:[#allocation5 + $0x160] sm:$0xff]  ;;  %v496_v25 = vld [vmem:[#allocation5 + $0x190] sm:$0xff]  ;;  %663 = vmatprep.subr.mxu1 %v497_v24 }
  0xcd   : > { %599 = vmatpush1.msra.mxu0 %v470_v26  ;;  %v483_v56 = vld [vmem:[#allocation5 + $0x128] sm:$0xff]  ;;  %v482_v57 = vld [vmem:[#allocation5 + $0x120] sm:$0xff]  ;;  %v489_v26 = vld [vmem:[#allocation5 + $0x158] sm:$0xff]  ;;  %664 = vmatpush1.msra.mxu1 %v496_v25 }
  0xce   : > { %600 = vmatprep.subr.mxu0 %v463_v27  ;;  %v475_v58 = vld [vmem:[#allocation5 + $0xe8] sm:$0xff]  ;;  %v474_v59 = vld [vmem:[#allocation5 + $0xe0] sm:$0xff]  ;;  %v488_v27 = vld [vmem:[#allocation5 + $0x150] sm:$0xff]  ;;  %665 = vmatprep.subr.mxu1 %v489_v26 }
  0xcf   : > { %601 = vmatpush1.msra.mxu0 %v462_v28  ;;  %v467_v60 = vld [vmem:[#allocation5 + $0xa8] sm:$0xff]  ;;  %v466_v61 = vld [vmem:[#allocation5 + $0xa0] sm:$0xff]  ;;  %v481_v28 = vld [vmem:[#allocation5 + $0x118] sm:$0xff]  ;;  %666 = vmatpush1.msra.mxu1 %v488_v27 }
  0xd0   : > { %602 = vmatprep.subr.mxu0 %v455_v29  ;;  %v459_v62 = vld [vmem:[#allocation5 + $0x68] sm:$0xff]  ;;  %v458_v63 = vld [vmem:[#allocation5 + $0x60] sm:$0xff]  ;;  %v480_v29 = vld [vmem:[#allocation5 + $0x110] sm:$0xff]  ;;  %667 = vmatprep.subr.mxu1 %v481_v28 }
  0xd1   : > { %603 = vmatpush1.msra.mxu0 %v454_v30  ;;  %v451_v1 = vld [vmem:[#allocation5 + $0x28] sm:$0xff]  ;;  %v450_v2 = vld [vmem:[#allocation5 + $0x20] sm:$0xff]  ;;  %v473_v30 = vld [vmem:[#allocation5 + $0xd8] sm:$0xff]  ;;  %668 = vmatpush1.msra.mxu1 %v480_v29 }
  0xd2   : > { %604 = vmatprep.subr.mxu0 %v447_v31  ;;  %v472_v31 = vld [vmem:[#allocation5 + $0xd0] sm:$0xff]  ;;  %669 = vmatprep.subr.mxu1 %v473_v30  ;;  %v461_v6 = vld [vmem:[#allocation5 + $0x78] sm:$0xff]  ;;  %v2802_v11 = vld [vmem:[%s373_s12] sm:$0xff] }
  0xd3   : > { %605 = vmatpush1.msra.mxu0 %v446_v32  ;;  %v465_v32 = vld [vmem:[#allocation5 + $0x98] sm:$0xff]  ;;  %670 = vmatpush1.msra.mxu1 %v472_v31  ;;  %v460_v7 = vld [vmem:[#allocation5 + $0x70] sm:$0xff]  ;;  %v1086_v25 = vld [vmem:[#allocation7 + $0xe8] sm:$0xff] }
  0xd4   : > { %639 = vmatmul.mubr.f32.vlgmr.msra.gmra.mxu0 %v2780_v33  ;;  %716 = vmatprep.subr.mxu0 %v571_v34  ;;  %v464_v34 = vld [vmem:[#allocation5 + $0x90] sm:$0xff]  ;;  %v453_v8 = vld [vmem:[#allocation5 + $0x38] sm:$0xff]  ;;  %v1082_v27 = vld [vmem:[#allocation7 + $0xc8] sm:$0xff] }
  0xd5   : > { %717 = vmatpush1.msra.mxu0 %v570_v35  ;;  %780 = vmatprep.mubr.f32.mxu0 %v2496_v0  ;;  %v457_v35 = vld [vmem:[#allocation5 + $0x58] sm:$0xff]  ;;  %v452_v9 = vld [vmem:[#allocation5 + $0x30] sm:$0xff]  ;;  %v1081_v28 = vld [vmem:[#allocation7 + $0xc0] sm:$0xff] }
  0xd6   : > { %718 = vmatprep.subr.mxu0 %v563_v36  ;;  %671 = vmatprep.subr.mxu1 %v465_v32  ;;  %v456_v36 = vld [vmem:[#allocation5 + $0x50] sm:$0xff]  ;;  %v1088_v23 = vld [vmem:[#allocation7 + $0xf8] sm:$0xff]  ;;  %v1078_v31 = vld [vmem:[#allocation7 + $0xa8] sm:$0xff] }
  0xd7   : > { %719 = vmatpush1.msra.mxu0 %v562_v37  ;;  %672 = vmatpush1.msra.mxu1 %v464_v34  ;;  %v449_v37 = vld [vmem:[#allocation5 + $0x18] sm:$0xff]  ;;  %v1087_v24 = vld [vmem:[#allocation7 + $0xf0] sm:$0xff]  ;;  %v2831_v34 = vld [vmem:[%s391_s17] sm:$0xff] }
  0xd8   : > { %720 = vmatprep.subr.mxu0 %v555_v38  ;;  %673 = vmatprep.subr.mxu1 %v457_v35  ;;  %v448_v38 = vld [vmem:[#allocation5 + $0x10] sm:$0xff]  ;;  %v1080_v29 = vld [vmem:[#allocation7 + $0xb8] sm:$0xff] }
  0xd9   : > { %721 = vmatpush1.msra.mxu0 %v554_v39  ;;  %674 = vmatpush1.msra.mxu1 %v456_v36  ;;  %v573_v39 = vld [vmem:[#allocation5 + $0x3f8] sm:$0xff]  ;;  %v1083_v26 = vld [vmem:[#allocation7 + $0xd0] sm:$0xff] }
  0xda   : > { %722 = vmatprep.subr.mxu0 %v547_v40  ;;  %675 = vmatprep.subr.mxu1 %v449_v37  ;;  %v572_v40 = vld [vmem:[#allocation5 + $0x3f0] sm:$0xff] }
  0xdb   : > { %723 = vmatpush1.msra.mxu0 %v546_v41  ;;  %676 = vmatpush1.msra.mxu1 %v448_v38  ;;  %v565_v41 = vld [vmem:[#allocation5 + $0x3b8] sm:$0xff]  ;;  %v1079_v30 = vld [vmem:[#allocation7 + $0xb0] sm:$0xff] }
  0xdc   : > { %724 = vmatprep.subr.mxu0 %v539_v42  ;;  %710 = vmatmul.mubr.f32.vlgmr.msra.gmra.mxu1 %v2780_v33  ;;  %v564_v42 = vld [vmem:[#allocation5 + $0x3b0] sm:$0xff] }
  0xdd   : > { %725 = vmatpush1.msra.mxu0 %v538_v43  ;;  %787 = vmatprep.subr.mxu1 %v573_v39  ;;  %v557_v43 = vld [vmem:[#allocation5 + $0x378] sm:$0xff] }
  0xde   : > { %726 = vmatprep.subr.mxu0 %v531_v44  ;;  %788 = vmatpush1.msra.mxu1 %v572_v40  ;;  %v556_v44 = vld [vmem:[#allocation5 + $0x370] sm:$0xff] }
  0xdf   : > { %727 = vmatpush1.msra.mxu0 %v530_v45  ;;  %851 = vmatprep.mubr.f32.mxu1 %v2496_v0  ;;  %v549_v45 = vld [vmem:[#allocation5 + $0x338] sm:$0xff] }
  0xe0   : > { %728 = vmatprep.subr.mxu0 %v523_v46  ;;  %789 = vmatprep.subr.mxu1 %v565_v41  ;;  %v548_v46 = vld [vmem:[#allocation5 + $0x330] sm:$0xff]  ;;  %v1077_v41 = vld [vmem:[#allocation7 + $0xa0] sm:$0xff] }
  0xe1   : > { %729 = vmatpush1.msra.mxu0 %v522_v47  ;;  %790 = vmatpush1.msra.mxu1 %v564_v42  ;;  %v541_v47 = vld [vmem:[#allocation5 + $0x2f8] sm:$0xff] }
  0xe2   : > { %730 = vmatprep.subr.mxu0 %v515_v48  ;;  %791 = vmatprep.subr.mxu1 %v557_v43  ;;  %v540_v48 = vld [vmem:[#allocation5 + $0x2f0] sm:$0xff]  ;;  %v1076_v42 = vld [vmem:[#allocation7 + $0x98] sm:$0xff] }
  0xe3   : > { %731 = vmatpush1.msra.mxu0 %v514_v49  ;;  %792 = vmatpush1.msra.mxu1 %v556_v44  ;;  %v533_v49 = vld [vmem:[#allocation5 + $0x2b8] sm:$0xff]  ;;  %v1075_v43 = vld [vmem:[#allocation7 + $0x90] sm:$0xff] }
  0xe4   : > { %732 = vmatprep.subr.mxu0 %v507_v50  ;;  %793 = vmatprep.subr.mxu1 %v549_v45  ;;  %v532_v50 = vld [vmem:[#allocation5 + $0x2b0] sm:$0xff]  ;;  %v1074_v45 = vld [vmem:[#allocation7 + $0x88] sm:$0xff] }
  0xe5   : > { %733 = vmatpush1.msra.mxu0 %v506_v51  ;;  %794 = vmatpush1.msra.mxu1 %v548_v46  ;;  %v525_v51 = vld [vmem:[#allocation5 + $0x278] sm:$0xff]  ;;  %v1073_v46 = vld [vmem:[#allocation7 + $0x80] sm:$0xff] }
  0xe6   : > { %734 = vmatprep.subr.mxu0 %v499_v52  ;;  %795 = vmatprep.subr.mxu1 %v541_v47  ;;  %v524_v52 = vld [vmem:[#allocation5 + $0x270] sm:$0xff] }
  0xe7   : > { %735 = vmatpush1.msra.mxu0 %v498_v53  ;;  %796 = vmatpush1.msra.mxu1 %v540_v48  ;;  %v517_v53 = vld [vmem:[#allocation5 + $0x238] sm:$0xff] }
  0xe8   : > { %736 = vmatprep.subr.mxu0 %v491_v54  ;;  %797 = vmatprep.subr.mxu1 %v533_v49  ;;  %v516_v54 = vld [vmem:[#allocation5 + $0x230] sm:$0xff] }
  0xe9   : > { %737 = vmatpush1.msra.mxu0 %v490_v55  ;;  %798 = vmatpush1.msra.mxu1 %v532_v50  ;;  %v509_v55 = vld [vmem:[#allocation5 + $0x1f8] sm:$0xff] }
  0xea   : > { %738 = vmatprep.subr.mxu0 %v483_v56  ;;  %799 = vmatprep.subr.mxu1 %v525_v51  ;;  %v508_v56 = vld [vmem:[#allocation5 + $0x1f0] sm:$0xff] }
  0xeb   : > { %739 = vmatpush1.msra.mxu0 %v482_v57  ;;  %800 = vmatpush1.msra.mxu1 %v524_v52  ;;  %v501_v57 = vld [vmem:[#allocation5 + $0x1b8] sm:$0xff] }
  0xec   : > { %740 = vmatprep.subr.mxu0 %v475_v58  ;;  %801 = vmatprep.subr.mxu1 %v517_v53  ;;  %v500_v58 = vld [vmem:[#allocation5 + $0x1b0] sm:$0xff] }
  0xed   : > { %741 = vmatpush1.msra.mxu0 %v474_v59  ;;  %802 = vmatpush1.msra.mxu1 %v516_v54  ;;  %v493_v59 = vld [vmem:[#allocation5 + $0x178] sm:$0xff] }
  0xee   : > { %742 = vmatprep.subr.mxu0 %v467_v60  ;;  %803 = vmatprep.subr.mxu1 %v509_v55  ;;  %v492_v60 = vld [vmem:[#allocation5 + $0x170] sm:$0xff] }
  0xef   : > { %743 = vmatpush1.msra.mxu0 %v466_v61  ;;  %804 = vmatpush1.msra.mxu1 %v508_v56  ;;  %v485_v61 = vld [vmem:[#allocation5 + $0x138] sm:$0xff] }
  0xf0   : > { %744 = vmatprep.subr.mxu0 %v459_v62  ;;  %805 = vmatprep.subr.mxu1 %v501_v57  ;;  %v484_v62 = vld [vmem:[#allocation5 + $0x130] sm:$0xff] }
  0xf1   : > { %745 = vmatpush1.msra.mxu0 %v458_v63  ;;  %806 = vmatpush1.msra.mxu1 %v500_v58  ;;  %v477_v63 = vld [vmem:[#allocation5 + $0xf8] sm:$0xff] }
  0xf2   : > { %746 = vmatprep.subr.mxu0 %v451_v1  ;;  %807 = vmatprep.subr.mxu1 %v493_v59  ;;  %v476_v1 = vld [vmem:[#allocation5 + $0xf0] sm:$0xff] }
  0xf3   : > { %747 = vmatpush1.msra.mxu0 %v450_v2  ;;  %808 = vmatpush1.msra.mxu1 %v492_v60  ;;  %v469_v2 = vld [vmem:[#allocation5 + $0xb8] sm:$0xff] }
  0xf4   : > { %781 = vmatmul.mubr.f32.vlgmr.msra.gmra.mxu0 %v2780_v33  ;;  %809 = vmatprep.subr.mxu1 %v485_v61  ;;  %v2806_v12 = vld [vmem:[%s382_s26] sm:$0xff] }
  0xf5   : > { %810 = vmatpush1.msra.mxu1 %v484_v62  ;;  %v1069_v62 = vld [vmem:[#allocation7 + $0x78] sm:$0xff] }
  0xf6   : > { %811 = vmatprep.subr.mxu1 %v477_v63 }
  0xf7   : > { %812 = vmatpush1.msra.mxu1 %v476_v1  ;;  %v1068_v1 = vld [vmem:[#allocation7 + $0x70] sm:$0xff] }
  0xf8   : > { %813 = vmatprep.subr.mxu1 %v469_v2  ;;  %v1067_v2 = vld [vmem:[#allocation7 + $0x68] sm:$0xff] }
  0xf9   : > { %814 = vmatpush1.msra.mxu1 %v468_v5  ;;  %v1066_v5 = vld [vmem:[#allocation7 + $0x60] sm:$0xff] }
  0xfa   : > { %815 = vmatprep.subr.mxu1 %v461_v6  ;;  %v1065_v6 = vld [vmem:[#allocation7 + $0x58] sm:$0xff] }
  0xfb   : > { %816 = vmatpush1.msra.mxu1 %v460_v7  ;;  %v1064_v7 = vld [vmem:[#allocation7 + $0x50] sm:$0xff] }
  0xfc   : > { %817 = vmatprep.subr.mxu1 %v453_v8  ;;  %v1063_v8 = vld [vmem:[#allocation7 + $0x48] sm:$0xff] }
  0xfd   : > { %818 = vmatpush1.msra.mxu1 %v452_v9  ;;  %v1062_v9 = vld [vmem:[#allocation7 + $0x40] sm:$0xff] }
  0xfe   : > { %852 = vmatmul.mubr.f32.vlgmr.msra.gmra.mxu1 %v2780_v33 }
 0x194   : > { %v2785_v3 = vpop.f32.mrf.mxu0 }
 0x195   : > { %v863_v33 = vmul.f32 %v2785_v3, %v2802_v11 }
 0x196   : > { %v2787_v4 = vpop.f32.mrf.mxu0 }
 0x197   : > { %869 = vrot.lane.b32.xlu1 %v2787_v4, %s2497_s30  ;;  %v868_v21 = vmul.f32 %v2787_v4, %v2802_v11  ;;  %v1084_v4 = vld [vmem:[#allocation7 + $0xd8] sm:$0xff] }
 0x19c   : > { %v2839_v44 = vpop.f32.mrf.mxu1 }
 0x19e   : > { %v2844_v47 = vpop.f32.mrf.mxu1 }
 0x1b4   : > { %v2791_v10 = vpop.f32.mrf.mxu0 }
 0x1b5   : > { %859 = vrot.lane.b32.xlu0 %v2791_v10, %s2497_s30  ;;  %v858_v14 = vmul.f32 %v2791_v10, %v2802_v11 }
 0x1b6   : > { %v784_v32 = vpop.f32.mrf.mxu0 }
 0x1b7   : > { %v1229_v56 = vmul.f32 %v784_v32, %v2802_v11 }
 0x1b9   : > { %864 = vrot.lane.b32.xlu0 %v2785_v3, %s2497_s30  ;;  %v1085_v3 = vld [vmem:[#allocation7 + $0xe0] sm:$0xff] }
 0x1be   : > { %v853_v48 = vpop.f32.mrf.mxu1 }
 0x1bf   : > { %1947 = vmatprep.subr.mxu1 %v853_v48 }
 0x1c0   : > { %1948 = vmatpush3.msra.mxu1 %v853_v48 }
 0x1c1   : > { %1987 = vmatprep.subr.mxu1 %v2496_v0 }
 0x209   : > { %v870_v15 = vpop.permute.xlu1 %869 }
 0x20a   : > { %v871_v18 = vmul.f32 %v870_v15, %v2806_v12  ;;  %v1059_v15 = vld [vmem:[#allocation7 + $0x28] sm:$0xff] }
 0x20c   : > { %v872_v10 = vadd.f32 %v871_v18, %v868_v21  ;;  %v1056_v18 = vld [vmem:[#allocation7 + $0x10] sm:$0xff] }
 0x227   : > { %v860_v13 = vpop.permute.xlu0 %859 }
 0x228   : > { %v861_v16 = vmul.f32 %v860_v13, %v2806_v12  ;;  %v1061_v13 = vld [vmem:[#allocation7 + $0x38] sm:$0xff] }
 0x22a   : > { %v862_v17 = vadd.f32 %v861_v16, %v858_v14  ;;  %v1060_v14 = vld [vmem:[#allocation7 + $0x30] sm:$0xff]  ;;  %v1058_v16 = vld [vmem:[#allocation7 + $0x20] sm:$0xff] }
 0x22b   : > { %v865_v19 = vpop.permute.xlu0 %864 }
 0x22c   : > { %v866_v20 = vmul.f32 %v865_v19, %v2806_v12  ;;  %1942 = vmatprep.subr.mxu0 %v862_v17  ;;  %v1055_v19 = vld [vmem:[#allocation7 + $0x8] sm:$0xff] }
 0x22d   : > { %1943 = vmatpush3.xpose.msra.mxu0 %v862_v17  ;;  %v1057_v17 = vld [vmem:[#allocation7 + $0x18] sm:$0xff] }
 0x22e   : > { %v867_v22 = vadd.f32 %v866_v20, %v863_v33  ;;  %1952 = vmatprep.subr.mxu0 %v2496_v0  ;;  %v1054_v33 = vld [vmem:[#allocation7] sm:$0xff]  ;;  %v855_v20 = vpop.f32.mrf.mxu1 }
 0x230   : > { %1944 = vmatprep.mubr.f32.mxu0 %v867_v22 }
 0x231   : > { %1945 = vmatmul.mubr.f32.vlgmr.msra.gmra.mxu0 %v872_v10 }
 0x232   : > { %1953 = vmatpush3.msra.mxu0 %v1088_v23  ;;  %1984 = vmatprep.mubr.msk.f32.mxu0 %vm2498_vm1, %v2496_v0 }
 0x233   : > { %1954 = vmatprep.subr.mxu0 %v2496_v0 }
 0x234   : > { %1955 = vmatpush3.msra.mxu0 %v1087_v24 }
 0x235   : > { %1956 = vmatprep.subr.mxu0 %v2496_v0 }
 0x236   : > { %1957 = vmatpush3.msra.mxu0 %v1086_v25 }
 0x237   : > { %1958 = vmatprep.subr.mxu0 %v2496_v0 }
 0x238   : > { %1959 = vmatpush3.msra.mxu0 %v1085_v3 }
 0x239   : > { %1960 = vmatprep.subr.mxu0 %v2496_v0 }
 0x23a   : > { %1961 = vmatpush3.msra.mxu0 %v1084_v4 }
 0x23b   : > { %1962 = vmatprep.subr.mxu0 %v2496_v0 }
 0x23c   : > { %1963 = vmatpush3.msra.mxu0 %v1083_v26 }
 0x23d   : > { %1964 = vmatprep.subr.mxu0 %v2496_v0 }
 0x23e   : > { %1965 = vmatpush3.msra.mxu0 %v1082_v27  ;;  %v1234_v27 = vmul.f32 %v2839_v44, %v2802_v11 }
 0x23f   : > { %1966 = vmatprep.subr.mxu0 %v2496_v0 }
 0x240   : > { %1967 = vmatpush3.msra.mxu0 %v1081_v28 }
 0x241   : > { %1968 = vmatprep.subr.mxu0 %v2496_v0 }
 0x242   : > { %1969 = vmatpush3.msra.mxu0 %v1080_v29 }
 0x243   : > { %1970 = vmatprep.subr.mxu0 %v2496_v0 }
 0x244   : > { %1971 = vmatpush3.msra.mxu0 %v1079_v30 }
 0x245   : > { %1972 = vmatprep.subr.mxu0 %v2496_v0 }
 0x246   : > { %1973 = vmatpush3.msra.mxu0 %v1078_v31 }
 0x247   : > { %1974 = vmatprep.subr.mxu0 %v2496_v0 }
 0x248   : > { %1975 = vmatpush3.msra.mxu0 %v1077_v41 }
 0x249   : > { %1976 = vmatprep.subr.mxu0 %v2496_v0 }
 0x24a   : > { %1977 = vmatpush3.msra.mxu0 %v1076_v42 }
 0x24b   : > { %1978 = vmatprep.subr.mxu0 %v2496_v0 }
 0x24c   : > { %1979 = vmatpush3.msra.mxu0 %v1075_v43 }
 0x24d   : > { %1980 = vmatprep.subr.mxu0 %v2496_v0 }
 0x24e   : > { %1981 = vmatpush3.msra.mxu0 %v1074_v45 }
 0x24f   : > { %1982 = vmatprep.subr.mxu0 %v2496_v0 }
 0x250   : > { %1983 = vmatpush3.msra.mxu0 %v1073_v46 }
 0x2f1   : > { %v1946_v35 = vpop.f32.mrf.mxu0 }
 0x2f2   : > { %v945_v36 = vadd.f32 %v1946_v35, %v2831_v34  ;;  %v1239_v35 = vmul.f32 %v2844_v47, %v2802_v11 }
 0x2f3   : > { %v939_v37 = vpop.f32.mrf.mxu0 }
 0x2f4   : > { %v940_v38 = vadd.f32 %v939_v37, %v2831_v34  ;;  %v952_v39 = vsel %vm948_vm0, %v945_v36, -inf }
 0x2f5   : > { %953 = vmax.xlane.f32.xlu0 %v952_v39 }
 0x2f6   : > { %v949_v40 = vsel %vm948_vm0, %v940_v38, -inf }
 0x2f7   : > { %950 = vmax.xlane.f32.xlu1 %v949_v40 }
 0x308   : > { %1230 = vrot.lane.b32.xlu1 %v784_v32, %s2497_s30 }
 0x30c   : > { %1240 = vrot.lane.b32.xlu1 %v2844_v47, %s2497_s30 }
 0x37e   : > { %v954_v49 = vpop.xlane.xlu0 %953 }
 0x37f   : > { %v956_v50 = vsub.f32 %v945_v36, %v954_v49 }
 0x380   : > { %v951_v51 = vpop.xlane.xlu1 %950 }
 0x381   : > { %v959_v52 = vmul.f32 1.442695, %v956_v50  ;;  %v955_v53 = vsub.f32 %v940_v38, %v951_v51 }
 0x383   : > { %2198 = vpow2.f32 %v959_v52  ;;  %v957_v54 = vmul.f32 1.442695, %v955_v53 }
 0x384   : > { %v1231_v55 = vpop.permute.xlu1 %1230 }
 0x385   : > { %2200 = vpow2.f32 %v957_v54  ;;  %v1232_v57 = vmul.f32 %v1231_v55, %v2806_v12 }
 0x387   : > { %v2851_v58 = vadd.f32 %v1232_v57, %v1229_v56  ;;  %v1530_v56 = vld [vmem:[#allocation7 + $0x1f8] sm:$0xff] }
 0x388   : > { %v1241_v21 = vpop.permute.xlu1 %1240  ;;  %v1440_v57 = vld [vmem:[#allocation7 + $0x178] sm:$0xff] }
 0x389   : > { %2022 = vmatprep.subr.mxu0 %v2851_v58  ;;  %v1242_v29 = vmul.f32 %v1241_v21, %v2806_v12  ;;  %v1518_v21 = vld [vmem:[#allocation7 + $0x198] sm:$0xff] }
 0x38b   : > { %v1243_v37 = vadd.f32 %v1242_v29, %v1239_v35 }
 0x390   : > { %v2854_v59 = vpop.eup %2198 }
 0x391   : > { %v964_v60 = vsel %vm948_vm0, %v2854_v59, 0.0 }
 0x392   : > { %v2858_v61 = vpop.eup %2200  ;;  %965 = vadd.xlane.f32.xlu0 %v964_v60  ;;  %v1528_v60 = vld [vmem:[#allocation7 + $0x1e8] sm:$0xff] }
 0x393   : > { %1949 = vmatprep.mubr.msk.f32.mxu1 %vm948_vm0, %v2858_v61  ;;  %v961_v63 = vsel %vm948_vm0, %v2858_v61, 0.0 }
 0x394   : > { %1950 = vmatmul.mubr.msk.f32.vlgmr.msra.gmra.mxu1 %vm948_vm0, %v2854_v59  ;;  %962 = vadd.xlane.f32.xlu1 %v961_v63  ;;  %v1437_v63 = vld [vmem:[#allocation7 + $0x160] sm:$0xff] }
 0x395   : > { %1988 = vmatpush3.msra.mxu1 %v1069_v62  ;;  %2019 = vmatprep.mubr.msk.f32.mxu1 %vm2498_vm1, %v2496_v0  ;;  %v1527_v62 = vld [vmem:[#allocation7 + $0x1e0] sm:$0xff] }
 0x396   : > { %1989 = vmatprep.subr.mxu1 %v2496_v0 }
 0x397   : > { %1990 = vmatpush3.msra.mxu1 %v1068_v1  ;;  %v1526_v1 = vld [vmem:[#allocation7 + $0x1d8] sm:$0xff] }
 0x398   : > { %1991 = vmatprep.subr.mxu1 %v2496_v0 }
 0x399   : > { %1992 = vmatpush3.msra.mxu1 %v1067_v2  ;;  %v1436_v2 = vld [vmem:[#allocation7 + $0x158] sm:$0xff] }
 0x39a   : > { %1993 = vmatprep.subr.mxu1 %v2496_v0 }
 0x39b   : > { %1994 = vmatpush3.msra.mxu1 %v1066_v5  ;;  %v1525_v5 = vld [vmem:[#allocation7 + $0x1d0] sm:$0xff] }
 0x39c   : > { %1995 = vmatprep.subr.mxu1 %v2496_v0 }
 0x39d   : > { %1996 = vmatpush3.msra.mxu1 %v1065_v6  ;;  %v1435_v6 = vld [vmem:[#allocation7 + $0x150] sm:$0xff] }
 0x39e   : > { %1997 = vmatprep.subr.mxu1 %v2496_v0 }
 0x39f   : > { %1998 = vmatpush3.msra.mxu1 %v1064_v7  ;;  %v1524_v7 = vld [vmem:[#allocation7 + $0x1c8] sm:$0xff] }
 0x3a0   : > { %1999 = vmatprep.subr.mxu1 %v2496_v0 }
 0x3a1   : > { %2000 = vmatpush3.msra.mxu1 %v1063_v8  ;;  %v1434_v8 = vld [vmem:[#allocation7 + $0x148] sm:$0xff] }
 0x3a2   : > { %2001 = vmatprep.subr.mxu1 %v2496_v0 }
 0x3a3   : > { %2002 = vmatpush3.msra.mxu1 %v1062_v9  ;;  %v1523_v9 = vld [vmem:[#allocation7 + $0x1c0] sm:$0xff] }
 0x3a4   : > { %2003 = vmatprep.subr.mxu1 %v2496_v0 }
 0x3a5   : > { %2004 = vmatpush3.msra.mxu1 %v1061_v13  ;;  %v1433_v13 = vld [vmem:[#allocation7 + $0x140] sm:$0xff] }
 0x3a6   : > { %2005 = vmatprep.subr.mxu1 %v2496_v0 }
 0x3a7   : > { %2006 = vmatpush3.msra.mxu1 %v1060_v14  ;;  %v1522_v14 = vld [vmem:[#allocation7 + $0x1b8] sm:$0xff] }
 0x3a8   : > { %2007 = vmatprep.subr.mxu1 %v2496_v0  ;;  %1235 = vrot.lane.b32.xlu0 %v2839_v44, %s2497_s30 }
 0x3a9   : > { %2008 = vmatpush3.msra.mxu1 %v1059_v15  ;;  %v1432_v15 = vld [vmem:[#allocation7 + $0x138] sm:$0xff] }
 0x3aa   : > { %2009 = vmatprep.subr.mxu1 %v2496_v0 }
 0x3ab   : > { %2010 = vmatpush3.msra.mxu1 %v1058_v16  ;;  %v1521_v16 = vld [vmem:[#allocation7 + $0x1b0] sm:$0xff] }
 0x3ac   : > { %2011 = vmatprep.subr.mxu1 %v2496_v0 }
 0x3ad   : > { %2012 = vmatpush3.msra.mxu1 %v1057_v17  ;;  %v1431_v17 = vld [vmem:[#allocation7 + $0x130] sm:$0xff] }
 0x3ae   : > { %2013 = vmatprep.subr.mxu1 %v2496_v0 }
 0x3af   : > { %2014 = vmatpush3.msra.mxu1 %v1056_v18  ;;  %v1520_v18 = vld [vmem:[#allocation7 + $0x1a8] sm:$0xff] }
 0x3b0   : > { %2015 = vmatprep.subr.mxu1 %v2496_v0 }
 0x3b1   : > { %2016 = vmatpush3.msra.mxu1 %v1055_v19  ;;  %v1430_v19 = vld [vmem:[#allocation7 + $0x128] sm:$0xff] }
 0x3b2   : > { %2017 = vmatprep.subr.mxu1 %v2496_v0 }
 0x3b3   : > { %2018 = vmatpush3.msra.mxu1 %v1054_v33  ;;  %v1519_v33 = vld [vmem:[#allocation7 + $0x1a0] sm:$0xff] }
 0x3b4   : > { %2027 = vmatprep.subr.mxu1 %v855_v20 }
 0x41b   : > { %v966_v22 = vpop.xlane.xlu0 %965 }
 0x41c   : > { %2202 = vrcp.f32 %v966_v22  ;;  %v1428_v22 = vld [vmem:[#allocation7 + $0x118] sm:$0xff] }
 0x41d   : > { %v963_v10 = vpop.xlane.xlu1 %962 }
 0x41e   : > { %2204 = vrcp.f32 %v963_v10  ;;  %v1517_v10 = vld [vmem:[#allocation7 + $0x190] sm:$0xff] }
 0x41f   : > { %v1236_v4 = vpop.permute.xlu0 %1235 }
 0x420   : > { %v1237_v26 = vmul.f32 %v1236_v4, %v2806_v12  ;;  %v1425_v4 = vld [vmem:[#allocation7 + $0x100] sm:$0xff] }
 0x422   : > { %v1238_v31 = vadd.f32 %v1237_v26, %v1234_v27 }
 0x429   : > { %v2203_v23 = vpop.eup %2202 }
 0x42a   : > { %v1070_v24 = vmul.f32 %v2203_v23, %v2854_v59  ;;  %v1439_v59 = vld [vmem:[#allocation7 + $0x170] sm:$0xff] }
 0x42b   : > { %v2205_v25 = vpop.eup %2204 }
 0x42c   : > { %1849 = vst.msk [vmem:[%s2889_s15 + $0x8] sm:$0xff] %vm948_vm0, %v1070_v24  ;;  %v1052_v3 = vmul.f32 %v2205_v25, %v2858_v61  ;;  %v1438_v61 = vld [vmem:[#allocation7 + $0x168] sm:$0xff] }
 0x42d   : > { %v1516_v24 = vld [vmem:[#allocation7 + $0x188] sm:$0xff] }
 0x42e   : > { %1053 = vst.msk [vmem:[%s2889_s15] sm:$0xff] %vm948_vm0, %v1052_v3  ;;  %v1515_v3 = vld [vmem:[#allocation7 + $0x180] sm:$0xff] }
 0x454   : > { %v1951_v28 = vpop.f32.mrf.mxu1 }
 0x455   : > { %v1051_v30 = vmul.f32 %v2203_v23, %v1951_v28  ;;  %v1427_v23 = vld [vmem:[#allocation7 + $0x110] sm:$0xff] }
 0x456   : > { %v1041_v32 = vpop.f32.mrf.mxu1 }
 0x457   : > { %v1050_v36 = vmul.f32 %v2205_v25, %v1041_v32  ;;  %1985 = vmatmul.mubr.f32.vlgmr.msra.gmra.mxu0 %v1051_v30  ;;  %v1426_v25 = vld [vmem:[#allocation7 + $0x108] sm:$0xff] }
 0x458   : > { %2023 = vmatpush3.xpose.msra.mxu0 %v2851_v58  ;;  %2024 = vmatprep.mubr.f32.mxu0 %v1238_v31  ;;  %v1529_v58 = vld [vmem:[#allocation7 + $0x1f0] sm:$0xff] }
 0x459   : > { %2020 = vmatmul.mubr.f32.vlgmr.msra.gmra.mxu1 %v1050_v36  ;;  %2032 = vmatprep.subr.mxu0 %v2496_v0 }
 0x45a   : > { %2028 = vmatpush3.msra.mxu1 %v855_v20  ;;  %v1429_v20 = vld [vmem:[#allocation7 + $0x120] sm:$0xff] }
 0x45b   : > { %2025 = vmatmul.mubr.f32.vlgmr.msra.gmra.mxu0 %v1243_v37  ;;  %2067 = vmatprep.subr.mxu1 %v2496_v0 }
 0x45c   : > { %2064 = vmatprep.mubr.msk.f32.mxu0 %vm2498_vm1, %v2496_v0  ;;  %2033 = vmatpush3.msra.mxu0 %v1440_v57 }
 0x45d   : > { %2034 = vmatprep.subr.mxu0 %v2496_v0 }
 0x45e   : > { %2035 = vmatpush3.msra.mxu0 %v1439_v59 }
 0x45f   : > { %2036 = vmatprep.subr.mxu0 %v2496_v0 }
 0x460   : > { %2037 = vmatpush3.msra.mxu0 %v1438_v61 }
 0x461   : > { %2038 = vmatprep.subr.mxu0 %v2496_v0 }
 0x462   : > { %2039 = vmatpush3.msra.mxu0 %v1437_v63 }
 0x463   : > { %2040 = vmatprep.subr.mxu0 %v2496_v0 }
 0x464   : > { %2041 = vmatpush3.msra.mxu0 %v1436_v2 }
 0x465   : > { %2042 = vmatprep.subr.mxu0 %v2496_v0 }
 0x466   : > { %2043 = vmatpush3.msra.mxu0 %v1435_v6 }
 0x467   : > { %2044 = vmatprep.subr.mxu0 %v2496_v0 }
 0x468   : > { %2045 = vmatpush3.msra.mxu0 %v1434_v8 }
 0x469   : > { %2046 = vmatprep.subr.mxu0 %v2496_v0 }
 0x46a   : > { %2047 = vmatpush3.msra.mxu0 %v1433_v13 }
 0x46b   : > { %2048 = vmatprep.subr.mxu0 %v2496_v0 }
 0x46c   : > { %2049 = vmatpush3.msra.mxu0 %v1432_v15 }
 0x46d   : > { %2050 = vmatprep.subr.mxu0 %v2496_v0 }
 0x46e   : > { %2051 = vmatpush3.msra.mxu0 %v1431_v17 }
 0x46f   : > { %2052 = vmatprep.subr.mxu0 %v2496_v0 }
 0x470   : > { %2053 = vmatpush3.msra.mxu0 %v1430_v19 }
 0x471   : > { %2054 = vmatprep.subr.mxu0 %v2496_v0 }
 0x472   : > { %2055 = vmatpush3.msra.mxu0 %v1429_v20 }
 0x473   : > { %2056 = vmatprep.subr.mxu0 %v2496_v0 }
 0x474   : > { %2057 = vmatpush3.msra.mxu0 %v1428_v22 }
 0x475   : > { %2058 = vmatprep.subr.mxu0 %v2496_v0 }
 0x476   : > { %2059 = vmatpush3.msra.mxu0 %v1427_v23 }
 0x477   : > { %2060 = vmatprep.subr.mxu0 %v2496_v0 }
 0x478   : > { %2061 = vmatpush3.msra.mxu0 %v1426_v25 }
 0x479   : > { %2062 = vmatprep.subr.mxu0 %v2496_v0 }
 0x47a   : > { %2063 = vmatpush3.msra.mxu0 %v1425_v4 }
 0x517   : > { %v1155_v12 = vpop.f32.mrf.mxu0 }
 0x519   : > { %v1986_v38 = vpop.f32.mrf.mxu0  ;;  %v1225_v39 = vpop.f32.mrf.mxu1 }
 0x51a   : > { %v2907_v11 = vadd.f32 %v1225_v39, %v1155_v12 }
 0x51b   : > { %v2021_v40 = vpop.f32.mrf.mxu1  ;;  %v2026_v41 = vpop.f32.mrf.mxu0 }
 0x51c   : > { %v1316_v44 = vadd.f32 %v2026_v41, %v2831_v34 }
 0x51d   : > { %v1310_v42 = vpop.f32.mrf.mxu0 }
 0x51e   : > { %v1311_v43 = vadd.f32 %v1310_v42, %v2831_v34  ;;  %v1322_v46 = vsel %vm948_vm0, %v1316_v44, -inf }
 0x520   : > { %v1319_v45 = vsel %vm948_vm0, %v1311_v43, -inf }
 0x521   : > { %1320 = vmax.xlane.f32.xlu0 %v1319_v45 }
 0x525   : > { %1323 = vmax.xlane.f32.xlu0 %v1322_v46 }
 0x5aa   : > { %v1321_v47 = vpop.xlane.xlu0 %1320 }
 0x5ab   : > { %v1325_v48 = vsub.f32 %v1311_v43, %v1321_v47 }
 0x5ad   : > { %v1327_v49 = vmul.f32 1.442695, %v1325_v48 }
 0x5ae   : > { %v1324_v50 = vpop.xlane.xlu0 %1323 }
 0x5af   : > { %2206 = vpow2.f32 %v1327_v49  ;;  %v1326_v51 = vsub.f32 %v1316_v44, %v1324_v50 }
 0x5b1   : > { %v1329_v52 = vmul.f32 1.442695, %v1326_v51 }
 0x5b3   : > { %2208 = vpow2.f32 %v1329_v52 }
 0x5bc   : > { %v2913_v53 = vpop.eup %2206 }
 0x5bd   : > { %2029 = vmatprep.mubr.msk.f32.mxu1 %vm948_vm0, %v2913_v53  ;;  %v1331_v34 = vsel %vm948_vm0, %v2913_v53, 0.0 }
 0x5be   : > { %1332 = vadd.xlane.f32.xlu1 %v1331_v34 }
 0x5c0   : > { %v2919_v54 = vpop.eup %2208 }
 0x5c1   : > { %2030 = vmatmul.mubr.msk.f32.vlgmr.msra.gmra.mxu1 %vm948_vm0, %v2919_v54  ;;  %v1334_v55 = vsel %vm948_vm0, %v2919_v54, 0.0 }
 0x5c2   : > { %1335 = vadd.xlane.f32.xlu0 %v1334_v55  ;;  %2099 = vmatprep.mubr.msk.f32.mxu1 %vm2498_vm1, %v2496_v0 }
 0x5c3   : > { %2068 = vmatpush3.msra.mxu1 %v1530_v56 }
 0x5c4   : > { %2069 = vmatprep.subr.mxu1 %v2496_v0 }
 0x5c5   : > { %2070 = vmatpush3.msra.mxu1 %v1529_v58 }
 0x5c6   : > { %2071 = vmatprep.subr.mxu1 %v2496_v0 }
 0x5c7   : > { %2072 = vmatpush3.msra.mxu1 %v1528_v60 }
 0x5c8   : > { %2073 = vmatprep.subr.mxu1 %v2496_v0 }
 0x5c9   : > { %2074 = vmatpush3.msra.mxu1 %v1527_v62 }
 0x5ca   : > { %2075 = vmatprep.subr.mxu1 %v2496_v0 }
 0x5cb   : > { %2076 = vmatpush3.msra.mxu1 %v1526_v1 }
 0x5cc   : > { %2077 = vmatprep.subr.mxu1 %v2496_v0 }
 0x5cd   : > { %2078 = vmatpush3.msra.mxu1 %v1525_v5 }
 0x5ce   : > { %2079 = vmatprep.subr.mxu1 %v2496_v0 }
 0x5cf   : > { %2080 = vmatpush3.msra.mxu1 %v1524_v7 }
 0x5d0   : > { %2081 = vmatprep.subr.mxu1 %v2496_v0 }
 0x5d1   : > { %2082 = vmatpush3.msra.mxu1 %v1523_v9 }
 0x5d2   : > { %2083 = vmatprep.subr.mxu1 %v2496_v0 }
 0x5d3   : > { %2084 = vmatpush3.msra.mxu1 %v1522_v14 }
 0x5d4   : > { %2085 = vmatprep.subr.mxu1 %v2496_v0 }
 0x5d5   : > { %2086 = vmatpush3.msra.mxu1 %v1521_v16 }
 0x5d6   : > { %2087 = vmatprep.subr.mxu1 %v2496_v0 }
 0x5d7   : > { %2088 = vmatpush3.msra.mxu1 %v1520_v18 }
 0x5d8   : > { %2089 = vmatprep.subr.mxu1 %v2496_v0 }
 0x5d9   : > { %2090 = vmatpush3.msra.mxu1 %v1519_v33 }
 0x5da   : > { %2091 = vmatprep.subr.mxu1 %v2496_v0 }
 0x5db   : > { %2092 = vmatpush3.msra.mxu1 %v1518_v21 }
 0x5dc   : > { %2093 = vmatprep.subr.mxu1 %v2496_v0 }
 0x5dd   : > { %2094 = vmatpush3.msra.mxu1 %v1517_v10 }
 0x5de   : > { %2095 = vmatprep.subr.mxu1 %v2496_v0 }
 0x5df   : > { %2096 = vmatpush3.msra.mxu1 %v1516_v24 }
 0x5e0   : > { %2097 = vmatprep.subr.mxu1 %v2496_v0 }
 0x5e1   : > { %2098 = vmatpush3.msra.mxu1 %v1515_v3 }
 0x647   : > { %v1333_v26 = vpop.xlane.xlu1 %1332 }
 0x648   : > { %2210 = vrcp.f32 %v1333_v26 }
 0x64b   : > { %v1336_v27 = vpop.xlane.xlu0 %1335 }
 0x64c   : > { %2212 = vrcp.f32 %v1336_v27 }
 0x655   : > { %v2211_v28 = vpop.eup %2210 }
 0x656   : > { %v1422_v29 = vmul.f32 %v2211_v28, %v2913_v53 }
 0x658   : > { %1852 = vst.msk [vmem:[%s2889_s15 + $0x10] sm:$0xff] %vm948_vm0, %v1422_v29 }
 0x659   : > { %v2213_v30 = vpop.eup %2212 }
 0x65a   : > { %v1512_v31 = vmul.f32 %v2213_v30, %v2919_v54 }
 0x65c   : > { %1853 = vst.msk [vmem:[%s2889_s15 + $0x18] sm:$0xff] %vm948_vm0, %v1512_v31 }
 0x681   : > { %v2031_v0 = vpop.f32.mrf.mxu1 }
 0x682   : > { %v1421_v32 = vmul.f32 %v2213_v30, %v2031_v0 }
 0x683   : > { %v1411_v35 = vpop.f32.mrf.mxu1 }
 0x684   : > { %v1420_v36 = vmul.f32 %v2211_v28, %v1411_v35  ;;  %2100 = vmatmul.mubr.f32.vlgmr.msra.gmra.mxu1 %v1421_v32 }
 0x686   : > { %2065 = vmatmul.mubr.f32.vlgmr.msra.gmra.mxu0 %v1420_v36 }
 0x687   : > { %2391 = shalt.err (!%p2388_p1)
}
 0x688   : > { %s2392_s0 = scalar_lea.hbm %s2968_s24, 512  ;;  %s2396_s12 = scalar_lea.hbm %s3039_s7, 1024 }
 0x689   : > { %p2393_p6 = scmp.ne.s32.totalorder %s2968_s24, %s2392_s0  ;;  %p2397_p13 = scmp.lt.s32.totalorder %s2968_s24, %s3039_s7 }
 0x68a   : > { %p2398_p9 = scmp.lt.s32.totalorder %s2396_s12, %s2392_s0 }
 0x68b   : > { %p2394_p12 = pnand %p2393_p6, %p3076_p5 }
 0x68c   : > { %p2399_p10 = por %p2398_p9, %p2397_p13 }
 0x68d   : > { %p2395_p7 = pneg %p2394_p12 }
 0x68f   : > { %p2400_p3 = pnand %p2399_p10, %p2395_p7 }
 0x691   : > { %2403 = shalt.err (!%p2400_p3)
}
 0x692   : > { %s2500_s17 = smov 128   ;;  %s2501_s30 = smov 8  }
 0x693   : > { %2119 = dma.vmem_to_hbm [thread:$0]  (%p3076_p5), %s2970_s16, 512, %s2968_s24, %s1609_s29, %s2500_s17, %s2500_s17, %s2501_s30  }
 0x694   : > { %s1856_s19 = sshll.u32 %s2564_s28, 7  ;;  %s434_s15 = scalar_lea.vmem [#allocation13], %s2751_s1 }
 0x695   : > { %s1622_s18 = sshll.u32 %s434_s15, 4  ;;  %s1620_s23 = scalar_lea.hbm %s3038_s6, %s1856_s19  ;;  %s1623_s18 = int_to_ptr.vmem [resolvable:$true] %s1622_s18 }
 0x696   : > { %s1604_s10 = scalar_lea.sflag [#allocation4], %s2748_s21  ;;  %s2404_s14 = scalar_lea.vmem %s1623_s18, 128 }
 0x697   : > { %p2405_p2 = scmp.ne.s32.totalorder %s1623_s18, %s2404_s14  ;;  %s2502_s16 = smov [#allocation13]  }
 0x698   : > { %s2408_s28 = sshll.u32 %s2502_s16, 4  ;;  %s2409_s28 = int_to_ptr.vmem [resolvable:$false] %s2408_s28 }
 0x699   : > { %p2406_p4 = pnand %p2405_p2, %p3076_p5  ;;  %s2410_s1 = scalar_lea.vmem %s2409_s28, 256 }
 0x69a   : > { %p2411_p11 = scmp.lt.s32.totalorder %s1623_s18, %s2409_s28  ;;  %p2412_p0 = scmp.lt.s32.totalorder %s2410_s1, %s2404_s14 }
 0x69b   : > { %p2407_p8 = pneg %p2406_p4 }
 0x69c   : > { %p2413_p1 = por %p2412_p0, %p2411_p11 }
 0x69e   : > { %p2414_p6 = pnand %p2413_p1, %p2407_p8 }
 0x744   : > { %v1597_v37 = vpop.f32.mrf.mxu1 }
 0x746   : > { %v1507_v12 = vpop.f32.mrf.mxu0  ;;  %v2101_v38 = vpop.f32.mrf.mxu1 }
 0x747   : > { %v1511_v39 = vadd.f32 %v1507_v12, %v2907_v11 }
 0x748   : > { %v2066_v40 = vpop.f32.mrf.mxu0 }
 0x749   : > { %v1601_v41 = vadd.f32 %v1597_v37, %v1511_v39 }
 0x74b   : > { %1602 = vst [vmem:[%s434_s15] sm:$0xff] %v1601_v41 }
 0x74c   : > { %2417 = shalt.err (!%p2414_p6)
}
 0x74d   : > { %s2418_s24 = scalar_lea.hbm %s1620_s23, 128  ;;  %s2422_s13 = scalar_lea.hbm %s3038_s6, 256 }
 0x74e   : > { %p2419_p12 = scmp.ne.s32.totalorder %s1620_s23, %s2418_s24  ;;  %p2423_p9 = scmp.lt.s32.totalorder %s1620_s23, %s3038_s6 }
 0x74f   : > { %p2424_p10 = scmp.lt.s32.totalorder %s2422_s13, %s2418_s24 }
 0x750   : > { %p2420_p7 = pnand %p2419_p12, %p3076_p5 }
 0x751   : > { %p2425_p3 = por %p2424_p10, %p2423_p9 }
 0x752   : > { %p2421_p13 = pneg %p2420_p7 }
 0x754   : > { %p2426_p2 = pnand %p2425_p3, %p2421_p13 }
 0x756   : > { %2429 = shalt.err (!%p2426_p2)
}
 0x757   : > { %2118 = dma.vmem_to_hbm [thread:$0]  (%p3076_p5), %s1623_s18, 128, %s1620_s23, %s1604_s10  }
 0x758 PF: > { %s3077_s11 = sld [smem:[#allocation22_spill]] }
 0x759   : > { %s3078_s12 = sld [smem:[#allocation25_spill]] }
 0x75a   : > { %s3079_s26 = sld [smem:[#allocation24_spill]] }
 0x75e   : > { %s1650_s27 = sand.u32 1, %s3077_s11  }
 0x75f   : > { %p3080_p4 = scmp.ne.s32.totalorder %s3078_s12, 0  ;;  %s1651_s17 = scalar_lea.sflag [#allocation4], %s1650_s27 }
 0x760   : > { %p3081_p8 = scmp.ge.s32.totalorder %s3079_s26, 2 }
 0x762   : > { %p2143_p11 = pnand %p3081_p8, %p3080_p4 }
 0x764   : > { %p2144_p0 = pneg %p2143_p11 }
 0x766   : > { %2463 = dma.done.wait (%p2144_p0), %s1651_s17, 128  }
 0x767   : > { %2465 = vsyncadd (%p2144_p0), %s1651_s17, 4294967168  ;;  %s1660_s30 = scalar_lea.sflag [#allocation15], %s1650_s27 }
 0x768   : > { %2467 = dma.done.wait (%p2144_p0), %s1660_s30, 512  }
 0x769   : > { %2469 = vsyncadd (%p2144_p0), %s1660_s30, 4294966784  ;;  %s3082_s27 = sld [smem:[#allocation26_spill]]  ;;  %s3085_s24 = smov %s2476_s25 }
 0x76a   : > { %s3083_s19 = sld [smem:[#allocation23_spill]] }
 0x76b   : > { %s3084_s26 = sld [smem:[#allocation27_spill]] }
 0x76f   : > { %p31_p5 = scmp.ge.s32.totalorder %s3082_s27, 4  }
 0x770   : > { %s3086_s25 = smov %s3083_s19 }
 0x771   :  { %33 = sbr.rel (!%p31_p5) target bundleno = 15 (0xf), region = 154 }
 0x776   :  { %1665 = vsyncpa [#allocation3], 1 }
 0x777   :  { %1667 = vsyncpa [#allocation3 + $0x1], 1 }
 0x778   :  { %1668 = vsyncpa [#allocation6], 1 }
 0x779   :  { %1669 = vsyncpa [#allocation9], 1 }
 0x77a   :  { %1671 = vsyncpa [#allocation9 + $0x1], 1 }
 0x77b   :  { %1672 = vsyncpa [#allocation12], 1 }
 0x77c   :  { %1674 = vsyncpa [#allocation12 + $0x1], 1 }
 0x77d   :  { %1675 = vsyncpa [#allocation4], 1 }
 0x77e   :  { %1677 = vsyncpa [#allocation4 + $0x1], 1 }
 0x77f   :  { %1678 = vsyncpa [#allocation15], 1 }
 0x780   :  { %1680 = vsyncpa [#allocation15 + $0x1], 1 }

</bundles_post_ra>
